<compile_context>
chip_gen: v5e
topology: v5e:2x2
jax: 0.10.0
libtpu: 0.0.40
codegen_flags: <defaults>
</compile_context>

<pallas_src>
import functools
import math

import jax
import jax.numpy as jnp
from jax import lax
from jax.experimental import pallas as pl
from jax.experimental.pallas import tpu as pltpu


def _netvlad_kernel(x_ref, c_ref, wr_ref, gamma_ref, beta_ref, o_ref,
                    *, n_valid, out_valid):
    # x_ref:     (B_blk, d, Np)  features, native d-major layout (lanes = N)
    # c_ref:     (K, d)          centroids (== 1x1-conv weight)
    # wr_ref:    (K*d, out_p)    reduction weight, transposed+flattened
    # gamma_ref: (1, out_p)      LayerNorm scale (zeros in padded columns)
    # beta_ref:  (1, out_p)      LayerNorm shift (zeros in padded columns)
    # o_ref:     (B_blk, out_p)
    x = x_ref[...]                                    # (B, d, Np) compute dtype
    c = c_ref[...]                                    # (K, d)     compute dtype
    B_blk, d, Np = x.shape
    K = c.shape[0]

    # --- 1x1-conv logits, whole block at once: (B, K, Np); softmax over K ----
    cb = jnp.broadcast_to(c[None], (B_blk, K, d))     # tiny, materialized once
    logits = jnp.einsum("bkd,bdn->bkn", cb, x,
                        preferred_element_type=jnp.float32)
    m = jnp.max(logits, axis=1, keepdims=True)        # (B, 1, Np)
    e = jnp.exp(logits - m)
    a = e / jnp.sum(e, axis=1, keepdims=True)         # (B, K, Np) soft-assign

    # Zero soft-assign of lane-padded columns so they contribute nothing.
    # TODO(synk): the module's optional `mask` would be applied here as one
    # extra per-column multiply on this lane-dense (B, K, Np) tile.
    if n_valid != Np:
        col = lax.broadcasted_iota(jnp.int32, (1, 1, Np), 2)
        a = a * (col < n_valid).astype(a.dtype)

    # --- VLAD aggregation: fused cluster loop as ONE batched matmul ----------
    #   vlad[b,k,:] = sum_n a[b,k,n] x[b,:,n] - (sum_n a[b,k,n]) c[k,:]
    ax = jnp.einsum("bkn,bdn->bkd", a.astype(x.dtype), x,
                    preferred_element_type=jnp.float32)          # (B, K, d)
    s = jnp.sum(a, axis=2, keepdims=True)                        # (B, K, 1)
    vlad = ax - s * c.astype(jnp.float32)[None]                  # (B, K, d)

    # --- intra-normalization over d (F.normalize, eps=1e-12) -----------------
    nrm = jnp.sqrt(jnp.sum(vlad * vlad, axis=2, keepdims=True))  # (B, K, 1)
    vlad = vlad / jnp.maximum(nrm, 1e-12)

    # --- global L2 normalization over (K, d), no flatten needed --------------
    gsq = jnp.sum(jnp.sum(vlad * vlad, axis=2, keepdims=True),
                  axis=1, keepdims=True)                         # (B, 1, 1)
    vlad = vlad / jnp.maximum(jnp.sqrt(gsq), 1e-12)

    # --- reduction linear: ONE (B, K*d) x (K*d, out_p) MXU matmul ------------
    vflat = vlad.reshape(B_blk, K * d)
    y = jnp.dot(vflat.astype(wr_ref.dtype), wr_ref[...],
                preferred_element_type=jnp.float32)              # (B, out_p)

    # --- LayerNorm over the true outdims (padded columns are exactly zero) ---
    sum_y = jnp.sum(y, axis=-1, keepdims=True)
    sum_y2 = jnp.sum(y * y, axis=-1, keepdims=True)
    mu = sum_y / out_valid
    var = sum_y2 / out_valid - mu * mu
    yn = (y - mu) * lax.rsqrt(var + 1e-5)
    o_ref[...] = (yn * gamma_ref[...] + beta_ref[...]).astype(o_ref.dtype)


def netvlad_forward(x_nchw, centroids, w_red, gamma, beta, *,
                    batch_block=8, compute_dtype=jnp.bfloat16,
                    out_dtype=jnp.float32):
    """NetVLAD forward (mask=None path of the PyTorch module).

    x_nchw:     (b, d, t, r)
    centroids:  (K, d)           -- also the 1x1-conv weight (reset_parameters)
    w_red:      (outdims, K*d)   -- reduction_layer.weight
    gamma/beta: (outdims,)       -- LayerNorm affine
    """
    b, d, t, r = x_nchw.shape
    K = centroids.shape[0]
    outdims = w_red.shape[0]
    N = t * r

    # Lane-dense padding targets (multiples of 128).
    Np = pl.cdiv(N, 128) * 128
    out_p = pl.cdiv(outdims, 128) * 128

    # Native layout: (b, d, t, r) -> (b, d, N) is a pure reshape; the bf16 cast
    # and N-pad fuse into the same wrapper-side copy.
    x = x_nchw.reshape(b, d, N).astype(compute_dtype)
    if Np != N:
        x = jnp.pad(x, ((0, 0), (0, 0), (0, Np - N)))
    c = centroids.astype(compute_dtype)

    # Reduction weight: (out, K*d) -> (K*d, out_p).  Row-major K*d ordering
    # matches vlad.reshape(b, -1) in the reference (flat index = k*d + dd).
    wr = jnp.transpose(w_red).astype(compute_dtype)
    gamma2 = gamma.reshape(1, outdims).astype(jnp.float32)
    beta2 = beta.reshape(1, outdims).astype(jnp.float32)
    if out_p != outdims:
        wr = jnp.pad(wr, ((0, 0), (0, out_p - outdims)))
        gamma2 = jnp.pad(gamma2, ((0, 0), (0, out_p - outdims)))
        beta2 = jnp.pad(beta2, ((0, 0), (0, out_p - outdims)))

    # Batch blocking: one (B_blk, out_p) dense tile per grid step.
    if b <= batch_block:
        B_blk = b                                  # single grid step
    else:
        B_blk = max(8, (batch_block // 8) * 8)     # sublane-aligned blocks
    b_pad = pl.cdiv(b, B_blk) * B_blk
    if b_pad != b:
        x = jnp.pad(x, ((0, b_pad - b), (0, 0), (0, 0)))
    grid = (b_pad // B_blk,)
    # NOTE(v7x): with >=2 grid steps the single "parallel" axis shards across
    # both TensorCores; raise b / lower batch_block for production shapes.

    kernel = functools.partial(_netvlad_kernel,
                               n_valid=N, out_valid=float(outdims))

    def build(single_buffer_invariants):
        inv_kwargs = {}
        if single_buffer_invariants:
            # Grid-invariant operands: no need to double-buffer them.
            inv_kwargs = dict(pipeline_mode=pl.Buffered(1))
        return pl.pallas_call(
            kernel,
            out_shape=jax.ShapeDtypeStruct((b_pad, out_p), out_dtype),
            grid_spec=pltpu.PrefetchScalarGridSpec(
                num_scalar_prefetch=0,
                grid=grid,
                in_specs=[
                    pl.BlockSpec((B_blk, d, Np), lambda i: (i, 0, 0)),
                    pl.BlockSpec((K, d), lambda i: (0, 0), **inv_kwargs),
                    pl.BlockSpec((K * d, out_p), lambda i: (0, 0), **inv_kwargs),
                    pl.BlockSpec((1, out_p), lambda i: (0, 0), **inv_kwargs),
                    pl.BlockSpec((1, out_p), lambda i: (0, 0), **inv_kwargs),
                ],
                out_specs=pl.BlockSpec((B_blk, out_p), lambda i: (i, 0)),
            ),
            compiler_params=pltpu.CompilerParams(
                dimension_semantics=("parallel",),
                # v5e default scoped-VMEM limit is 16 MiB; 64 MiB is safe on
                # every generation (== physical VMEM on v7x).
                vmem_limit_bytes=64 * 1024 * 1024,
            ),
        )

    args = (x, c, wr, gamma2, beta2)
    try:
        out = jax.block_until_ready(build(True)(*args))
    except Exception:
        # pl.Buffered(1) not accepted by this JAX build -> default buffering.
        out = jax.block_until_ready(build(False)(*args))
    return out[:b, :outdims]


def _reference_forward(x_nchw, centroids, w_red, gamma, beta):
    """Plain-JAX mirror of the PyTorch forward (mask=None)."""
    b = x_nchw.shape[0]
    logits = jnp.einsum("bdtr,kd->bktr", x_nchw, centroids)
    a = jax.nn.softmax(logits, axis=1)                              # (b,K,t,r)
    resid = x_nchw[:, None] - centroids[None, :, :, None, None]
    vlad = jnp.sum(resid * a[:, :, None], axis=(-2, -1))            # (b,K,d)
    vlad = vlad / jnp.maximum(
        jnp.linalg.norm(vlad, axis=2, keepdims=True), 1e-12)
    flat = vlad.reshape(b, -1)
    flat = flat / jnp.maximum(
        jnp.linalg.norm(flat, axis=1, keepdims=True), 1e-12)
    y = flat @ w_red.T
    mu = jnp.mean(y, axis=-1, keepdims=True)
    var = jnp.mean((y - mu) ** 2, axis=-1, keepdims=True)
    return (y - mu) / jnp.sqrt(var + 1e-5) * gamma + beta


if __name__ == "__main__":
    # Small, TPU-friendly shapes consistent with the module:
    # dims=128 (lane-native feature depth), num_clusters=8, outdims=128,
    # batch=2, spatial 8x8 (N=64, padded to 128 lanes -> exercises the
    # padded-column mask path).
    b, dims, t, r = 2, 128, 8, 8
    num_clusters, outdims = 8, 128

    key = jax.random.PRNGKey(0)
    k_x, k_c, k_w = jax.random.split(key, 3)

    x = jax.random.normal(k_x, (b, dims, t, r), dtype=jnp.float32)
    # centroids ~ randn / sqrt(dims); conv weight == centroids (reset_parameters)
    centroids = (jax.random.normal(k_c, (num_clusters, dims), dtype=jnp.float32)
                 / math.sqrt(dims))
    # reduction_layer.weight ~ N(0, 1/sqrt(K*dims)), shape (outdims, K*dims)
    w_red = (jax.random.normal(k_w, (outdims, num_clusters * dims),
                               dtype=jnp.float32)
             / math.sqrt(num_clusters * dims))
    gamma = jnp.ones((outdims,), dtype=jnp.float32)   # LayerNorm default init
    beta = jnp.zeros((outdims,), dtype=jnp.float32)

    ref = _reference_forward(x, centroids, w_red, gamma, beta)

    # f32 path: validates the kernel structure tightly.
    out_f32 = jax.block_until_ready(
        netvlad_forward(x, centroids, w_red, gamma, beta,
                        compute_dtype=jnp.float32))
    if not jnp.allclose(out_f32, ref, rtol=2e-3, atol=2e-3):
        raise AssertionError("Pallas NetVLAD (f32) mismatch vs JAX reference")

    # bf16 path (default): halved HBM traffic, f32 MXU accumulation.
    out_bf16 = jax.block_until_ready(
        netvlad_forward(x, centroids, w_red, gamma, beta))
    if not jnp.allclose(out_bf16, ref, rtol=4e-2, atol=4e-2):
        raise AssertionError("Pallas NetVLAD (bf16) mismatch vs JAX reference")

    print("KERNEL_OK")
</pallas_src>

<mosaic_0001>
module attributes {stable_mosaic.version = 11 : i64} {
  func.func @_netvlad_kernel(%arg0: i32, %arg1: memref<2x128x128xf32, #tpu.memory_space<vmem>>, %arg2: memref<8x128xf32, #tpu.memory_space<vmem>>, %arg3: memref<1024x128xf32, #tpu.memory_space<vmem>>, %arg4: memref<1x128xf32, #tpu.memory_space<vmem>>, %arg5: memref<1x128xf32, #tpu.memory_space<vmem>>, %arg6: memref<2x128xf32, #tpu.memory_space<vmem>>) attributes {dimension_semantics = [#tpu.dimension_semantics<parallel>], iteration_bounds = array<i64: 1>, scalar_prefetch = 0 : i64, scratch_operands = 0 : i64, tpu.core_type = #tpu.core_type<tc>, window_params = [{transform_indices = @transform_0, window_bounds = array<i64: 2, 128, 128>}, {pipeline_mode = #tpu.pipeline_mode<synchronous>, transform_indices = @transform_1, window_bounds = array<i64: 8, 128>}, {pipeline_mode = #tpu.pipeline_mode<synchronous>, transform_indices = @transform_2, window_bounds = array<i64: 1024, 128>}, {pipeline_mode = #tpu.pipeline_mode<synchronous>, transform_indices = @transform_3, window_bounds = array<i64: 1, 128>}, {pipeline_mode = #tpu.pipeline_mode<synchronous>, transform_indices = @transform_4, window_bounds = array<i64: 1, 128>}, {transform_indices = @transform_5, window_bounds = array<i64: 2, 128>}]} {
    %c0 = arith.constant 0 : index
    %c0_0 = arith.constant 0 : index
    %c0_1 = arith.constant 0 : index
    %0 = vector.load %arg1[%c0, %c0_0, %c0_1] : memref<2x128x128xf32, #tpu.memory_space<vmem>>, vector<2x128x128xf32>
    %c0_2 = arith.constant 0 : index
    %c0_3 = arith.constant 0 : index
    %1 = vector.load %arg2[%c0_2, %c0_3] : memref<8x128xf32, #tpu.memory_space<vmem>>, vector<8x128xf32>
    %2 = vector.shape_cast %1 : vector<8x128xf32> to vector<1x8x128xf32>
    %3 = vector.shape_cast %2 : vector<1x8x128xf32> to vector<1x8x128xf32>
    %4 = vector.broadcast %3 : vector<1x8x128xf32> to vector<2x8x128xf32>
    "tpu.trace_start"() <{level = 10 : i32, message = "bkd,bdn->bkn"}> : () -> ()
    %cst = arith.constant dense<0.000000e+00> : vector<2x8x128xf32>
    %5 = tpu.matmul %4, %0, %cst {dimension_numbers = #tpu.dot_dimension_numbers<[2], [1], [1], [2], [0, 0, 0, 1, 1, 2], [0], [0]>} : vector<2x8x128xf32>, vector<2x128x128xf32>, vector<2x8x128xf32> -> vector<2x8x128xf32>
    "tpu.trace_stop"() : () -> ()
    %cst_4 = arith.constant dense<0xFF800000> : vector<2x128xf32>
    %6 = vector.multi_reduction <maximumf>, %5, %cst_4 [1] : vector<2x8x128xf32> to vector<2x128xf32>
    %7 = vector.shape_cast %6 : vector<2x128xf32> to vector<2x1x128xf32>
    %8 = vector.broadcast %7 : vector<2x1x128xf32> to vector<2x8x128xf32>
    %9 = arith.subf %5, %8 : vector<2x8x128xf32>
    %10 = math.exp %9 : vector<2x8x128xf32>
    %cst_5 = arith.constant dense<0.000000e+00> : vector<2x128xf32>
    %11 = vector.multi_reduction <add>, %10, %cst_5 [1] : vector<2x8x128xf32> to vector<2x128xf32>
    %12 = vector.shape_cast %11 : vector<2x128xf32> to vector<2x1x128xf32>
    %13 = vector.broadcast %12 : vector<2x1x128xf32> to vector<2x8x128xf32>
    %14 = arith.divf %10, %13 : vector<2x8x128xf32>
    %15 = tpu.iota {dimensions = array<i32: 2>} : vector<1x1x128xi32>
    %c64_i32 = arith.constant 64 : i32
    %16 = vector.broadcast %c64_i32 : i32 to vector<1x1x128xi32>
    %17 = arith.cmpi slt, %15, %16 : vector<1x1x128xi32>
    %18 = arith.extui %17 : vector<1x1x128xi1> to vector<1x1x128xi32>
    %19 = arith.sitofp %18 : vector<1x1x128xi32> to vector<1x1x128xf32>
    %20 = vector.broadcast %19 : vector<1x1x128xf32> to vector<2x8x128xf32>
    %21 = arith.mulf %14, %20 : vector<2x8x128xf32>
    "tpu.trace_start"() <{level = 10 : i32, message = "bkn,bdn->bkd"}> : () -> ()
    %cst_6 = arith.constant dense<0.000000e+00> : vector<2x8x128xf32>
    %22 = tpu.matmul %21, %0, %cst_6 {dimension_numbers = #tpu.dot_dimension_numbers<[2], [2], [1], [1], [0, 0, 0, 1, 1, 1], [0], [0]>} : vector<2x8x128xf32>, vector<2x128x128xf32>, vector<2x8x128xf32> -> vector<2x8x128xf32>
    "tpu.trace_stop"() : () -> ()
    %cst_7 = arith.constant dense<0.000000e+00> : vector<2x8xf32>
    %23 = vector.multi_reduction <add>, %21, %cst_7 [2] : vector<2x8x128xf32> to vector<2x8xf32>
    %24 = vector.shape_cast %23 : vector<2x8xf32> to vector<2x8x1xf32>
    %25 = vector.shape_cast %1 : vector<8x128xf32> to vector<1x8x128xf32>
    %26 = vector.broadcast %24 : vector<2x8x1xf32> to vector<2x8x128xf32>
    %27 = vector.broadcast %25 : vector<1x8x128xf32> to vector<2x8x128xf32>
    %28 = arith.mulf %26, %27 : vector<2x8x128xf32>
    %29 = arith.subf %22, %28 : vector<2x8x128xf32>
    %30 = arith.mulf %29, %29 : vector<2x8x128xf32>
    %cst_8 = arith.constant dense<0.000000e+00> : vector<2x8xf32>
    %31 = vector.multi_reduction <add>, %30, %cst_8 [2] : vector<2x8x128xf32> to vector<2x8xf32>
    %32 = vector.shape_cast %31 : vector<2x8xf32> to vector<2x8x1xf32>
    %33 = math.sqrt %32 : vector<2x8x1xf32>
    %cst_9 = arith.constant 9.99999996E-13 : f32
    %34 = vector.broadcast %cst_9 : f32 to vector<2x8x1xf32>
    %35 = arith.maximumf %33, %34 : vector<2x8x1xf32>
    %36 = vector.broadcast %35 : vector<2x8x1xf32> to vector<2x8x128xf32>
    %37 = arith.divf %29, %36 : vector<2x8x128xf32>
    %38 = arith.mulf %37, %37 : vector<2x8x128xf32>
    %cst_10 = arith.constant dense<0.000000e+00> : vector<2x8xf32>
    %39 = vector.multi_reduction <add>, %38, %cst_10 [2] : vector<2x8x128xf32> to vector<2x8xf32>
    %40 = vector.shape_cast %39 : vector<2x8xf32> to vector<2x8x1xf32>
    %cst_11 = arith.constant dense<0.000000e+00> : vector<2x1xf32>
    %41 = vector.multi_reduction <add>, %40, %cst_11 [1] : vector<2x8x1xf32> to vector<2x1xf32>
    %42 = vector.shape_cast %41 : vector<2x1xf32> to vector<2x1x1xf32>
    %43 = math.sqrt %42 : vector<2x1x1xf32>
    %cst_12 = arith.constant 9.99999996E-13 : f32
    %44 = vector.broadcast %cst_12 : f32 to vector<2x1x1xf32>
    %45 = arith.maximumf %43, %44 : vector<2x1x1xf32>
    %46 = vector.broadcast %45 : vector<2x1x1xf32> to vector<2x8x128xf32>
    %47 = arith.divf %37, %46 : vector<2x8x128xf32>
    %48 = vector.shape_cast %47 : vector<2x8x128xf32> to vector<2x1024xf32>
    %c0_13 = arith.constant 0 : index
    %c0_14 = arith.constant 0 : index
    %49 = vector.load %arg3[%c0_13, %c0_14] : memref<1024x128xf32, #tpu.memory_space<vmem>>, vector<1024x128xf32>
    %cst_15 = arith.constant dense<0.000000e+00> : vector<2x128xf32>
    %50 = tpu.matmul %48, %49, %cst_15 {dimension_numbers = #tpu.dot_dimension_numbers<[1], [0], [0], [1], [0, 0, 1, 1], [], []>} : vector<2x1024xf32>, vector<1024x128xf32>, vector<2x128xf32> -> vector<2x128xf32>
    %cst_16 = arith.constant dense<0.000000e+00> : vector<2xf32>
    %51 = vector.multi_reduction <add>, %50, %cst_16 [1] : vector<2x128xf32> to vector<2xf32>
    %52 = vector.shape_cast %51 : vector<2xf32> to vector<2x1xf32>
    %53 = arith.mulf %50, %50 : vector<2x128xf32>
    %cst_17 = arith.constant dense<0.000000e+00> : vector<2xf32>
    %54 = vector.multi_reduction <add>, %53, %cst_17 [1] : vector<2x128xf32> to vector<2xf32>
    %55 = vector.shape_cast %54 : vector<2xf32> to vector<2x1xf32>
    %cst_18 = arith.constant 1.280000e+02 : f32
    %56 = vector.broadcast %cst_18 : f32 to vector<2x1xf32>
    %57 = arith.divf %52, %56 : vector<2x1xf32>
    %cst_19 = arith.constant 1.280000e+02 : f32
    %58 = vector.broadcast %cst_19 : f32 to vector<2x1xf32>
    %59 = arith.divf %55, %58 : vector<2x1xf32>
    %60 = arith.mulf %57, %57 : vector<2x1xf32>
    %61 = arith.subf %59, %60 : vector<2x1xf32>
    %62 = vector.broadcast %57 : vector<2x1xf32> to vector<2x128xf32>
    %63 = arith.subf %50, %62 : vector<2x128xf32>
    %cst_20 = arith.constant 9.99999974E-6 : f32
    %64 = vector.broadcast %cst_20 : f32 to vector<2x1xf32>
    %65 = arith.addf %61, %64 : vector<2x1xf32>
    %66 = math.rsqrt %65 : vector<2x1xf32>
    %67 = vector.broadcast %66 : vector<2x1xf32> to vector<2x128xf32>
    %68 = arith.mulf %63, %67 : vector<2x128xf32>
    %c0_21 = arith.constant 0 : index
    %c0_22 = arith.constant 0 : index
    %69 = vector.load %arg4[%c0_21, %c0_22] : memref<1x128xf32, #tpu.memory_space<vmem>>, vector<1x128xf32>
    %70 = vector.broadcast %69 : vector<1x128xf32> to vector<2x128xf32>
    %71 = arith.mulf %68, %70 : vector<2x128xf32>
    %c0_23 = arith.constant 0 : index
    %c0_24 = arith.constant 0 : index
    %72 = vector.load %arg5[%c0_23, %c0_24] : memref<1x128xf32, #tpu.memory_space<vmem>>, vector<1x128xf32>
    %73 = vector.broadcast %72 : vector<1x128xf32> to vector<2x128xf32>
    %74 = arith.addf %71, %73 : vector<2x128xf32>
    %c0_25 = arith.constant 0 : index
    %c0_26 = arith.constant 0 : index
    %75 = vector.load %arg6[%c0_25, %c0_26] : memref<2x128xf32, #tpu.memory_space<vmem>>, vector<2x128xf32>
    tpu.vector_store %arg6[%c0_25, %c0_26], %74 {strides = array<i32>} : memref<2x128xf32, #tpu.memory_space<vmem>>, vector<2x128xf32>,
    return
  }
  func.func @transform_0(%arg0: i32) -> (i32, i32, i32) {
    %c0_i32 = arith.constant 0 : i32
    %c0_i32_0 = arith.constant 0 : i32
    %c0_i32_1 = arith.constant 0 : i32
    return %arg0, %c0_i32, %c0_i32_0 : i32, i32, i32
  }
  func.func @transform_1(%arg0: i32) -> (i32, i32) {
    %c0_i32 = arith.constant 0 : i32
    %c0_i32_0 = arith.constant 0 : i32
    %c0_i32_1 = arith.constant 0 : i32
    return %c0_i32, %c0_i32_0 : i32, i32
  }
  func.func @transform_2(%arg0: i32) -> (i32, i32) {
    %c0_i32 = arith.constant 0 : i32
    %c0_i32_0 = arith.constant 0 : i32
    %c0_i32_1 = arith.constant 0 : i32
    return %c0_i32, %c0_i32_0 : i32, i32
  }
  func.func @transform_3(%arg0: i32) -> (i32, i32) {
    %c0_i32 = arith.constant 0 : i32
    %c0_i32_0 = arith.constant 0 : i32
    %c0_i32_1 = arith.constant 0 : i32
    return %c0_i32, %c0_i32_0 : i32, i32
  }
  func.func @transform_4(%arg0: i32) -> (i32, i32) {
    %c0_i32 = arith.constant 0 : i32
    %c0_i32_0 = arith.constant 0 : i32
    %c0_i32_1 = arith.constant 0 : i32
    return %c0_i32, %c0_i32_0 : i32, i32
  }
  func.func @transform_5(%arg0: i32) -> (i32, i32) {
    %c0_i32 = arith.constant 0 : i32
    %c0_i32_0 = arith.constant 0 : i32
    return %arg0, %c0_i32 : i32, i32
  }
}

module attributes {stable_mosaic.version = 11 : i64} {
  func.func @_netvlad_kernel(%arg0: i32, %arg1: memref<2x128x128xf32, #tpu.memory_space<vmem>>, %arg2: memref<8x128xf32, #tpu.memory_space<vmem>>, %arg3: memref<1024x128xf32, #tpu.memory_space<vmem>>, %arg4: memref<1x128xf32, #tpu.memory_space<vmem>>, %arg5: memref<1x128xf32, #tpu.memory_space<vmem>>, %arg6: memref<2x128xf32, #tpu.memory_space<vmem>>) attributes {dimension_semantics = [#tpu.dimension_semantics<parallel>], iteration_bounds = array<i64: 1>, scalar_prefetch = 0 : i64, scratch_operands = 0 : i64, tpu.core_type = #tpu.core_type<tc>, window_params = [{transform_indices = @transform_0, window_bounds = array<i64: 2, 128, 128>}, {pipeline_mode = #tpu.pipeline_mode<synchronous>, transform_indices = @transform_1, window_bounds = array<i64: 8, 128>}, {pipeline_mode = #tpu.pipeline_mode<synchronous>, transform_indices = @transform_2, window_bounds = array<i64: 1024, 128>}, {pipeline_mode = #tpu.pipeline_mode<synchronous>, transform_indices = @transform_3, window_bounds = array<i64: 1, 128>}, {pipeline_mode = #tpu.pipeline_mode<synchronous>, transform_indices = @transform_4, window_bounds = array<i64: 1, 128>}, {transform_indices = @transform_5, window_bounds = array<i64: 2, 128>}]} {
    %c0 = arith.constant 0 : index
    %c0_0 = arith.constant 0 : index
    %c0_1 = arith.constant 0 : index
    %0 = vector.load %arg1[%c0, %c0_0, %c0_1] : memref<2x128x128xf32, #tpu.memory_space<vmem>>, vector<2x128x128xf32>
    %c0_2 = arith.constant 0 : index
    %c0_3 = arith.constant 0 : index
    %1 = vector.load %arg2[%c0_2, %c0_3] : memref<8x128xf32, #tpu.memory_space<vmem>>, vector<8x128xf32>
    %2 = vector.shape_cast %1 : vector<8x128xf32> to vector<1x8x128xf32>
    %3 = vector.shape_cast %2 : vector<1x8x128xf32> to vector<1x8x128xf32>
    %4 = vector.broadcast %3 : vector<1x8x128xf32> to vector<2x8x128xf32>
    "tpu.trace_start"() <{level = 10 : i32, message = "bkd,bdn->bkn"}> : () -> ()
    %cst = arith.constant dense<0.000000e+00> : vector<2x8x128xf32>
    %5 = tpu.matmul %4, %0, %cst {dimension_numbers = #tpu.dot_dimension_numbers<[2], [1], [1], [2], [0, 0, 0, 1, 1, 2], [0], [0]>} : vector<2x8x128xf32>, vector<2x128x128xf32>, vector<2x8x128xf32> -> vector<2x8x128xf32>
    "tpu.trace_stop"() : () -> ()
    %cst_4 = arith.constant dense<0xFF800000> : vector<2x128xf32>
    %6 = vector.multi_reduction <maximumf>, %5, %cst_4 [1] : vector<2x8x128xf32> to vector<2x128xf32>
    %7 = vector.shape_cast %6 : vector<2x128xf32> to vector<2x1x128xf32>
    %8 = vector.broadcast %7 : vector<2x1x128xf32> to vector<2x8x128xf32>
    %9 = arith.subf %5, %8 : vector<2x8x128xf32>
    %10 = math.exp %9 : vector<2x8x128xf32>
    %cst_5 = arith.constant dense<0.000000e+00> : vector<2x128xf32>
    %11 = vector.multi_reduction <add>, %10, %cst_5 [1] : vector<2x8x128xf32> to vector<2x128xf32>
    %12 = vector.shape_cast %11 : vector<2x128xf32> to vector<2x1x128xf32>
    %13 = vector.broadcast %12 : vector<2x1x128xf32> to vector<2x8x128xf32>
    %14 = arith.divf %10, %13 : vector<2x8x128xf32>
    %15 = tpu.iota {dimensions = array<i32: 2>} : vector<1x1x128xi32>
    %c64_i32 = arith.constant 64 : i32
    %16 = vector.broadcast %c64_i32 : i32 to vector<1x1x128xi32>
    %17 = arith.cmpi slt, %15, %16 : vector<1x1x128xi32>
    %18 = arith.extui %17 : vector<1x1x128xi1> to vector<1x1x128xi32>
    %19 = arith.sitofp %18 : vector<1x1x128xi32> to vector<1x1x128xf32>
    %20 = vector.broadcast %19 : vector<1x1x128xf32> to vector<2x8x128xf32>
    %21 = arith.mulf %14, %20 : vector<2x8x128xf32>
    "tpu.trace_start"() <{level = 10 : i32, message = "bkn,bdn->bkd"}> : () -> ()
    %cst_6 = arith.constant dense<0.000000e+00> : vector<2x8x128xf32>
    %22 = tpu.matmul %21, %0, %cst_6 {dimension_numbers = #tpu.dot_dimension_numbers<[2], [2], [1], [1], [0, 0, 0, 1, 1, 1], [0], [0]>} : vector<2x8x128xf32>, vector<2x128x128xf32>, vector<2x8x128xf32> -> vector<2x8x128xf32>
    "tpu.trace_stop"() : () -> ()
    %cst_7 = arith.constant dense<0.000000e+00> : vector<2x8xf32>
    %23 = vector.multi_reduction <add>, %21, %cst_7 [2] : vector<2x8x128xf32> to vector<2x8xf32>
    %24 = vector.shape_cast %23 : vector<2x8xf32> to vector<2x8x1xf32>
    %25 = vector.shape_cast %1 : vector<8x128xf32> to vector<1x8x128xf32>
    %26 = vector.broadcast %24 : vector<2x8x1xf32> to vector<2x8x128xf32>
    %27 = vector.broadcast %25 : vector<1x8x128xf32> to vector<2x8x128xf32>
    %28 = arith.mulf %26, %27 : vector<2x8x128xf32>
    %29 = arith.subf %22, %28 : vector<2x8x128xf32>
    %30 = arith.mulf %29, %29 : vector<2x8x128xf32>
    %cst_8 = arith.constant dense<0.000000e+00> : vector<2x8xf32>
    %31 = vector.multi_reduction <add>, %30, %cst_8 [2] : vector<2x8x128xf32> to vector<2x8xf32>
    %32 = vector.shape_cast %31 : vector<2x8xf32> to vector<2x8x1xf32>
    %33 = math.sqrt %32 : vector<2x8x1xf32>
    %cst_9 = arith.constant 9.99999996E-13 : f32
    %34 = vector.broadcast %cst_9 : f32 to vector<2x8x1xf32>
    %35 = arith.maximumf %33, %34 : vector<2x8x1xf32>
    %36 = vector.broadcast %35 : vector<2x8x1xf32> to vector<2x8x128xf32>
    %37 = arith.divf %29, %36 : vector<2x8x128xf32>
    %38 = arith.mulf %37, %37 : vector<2x8x128xf32>
    %cst_10 = arith.constant dense<0.000000e+00> : vector<2x8xf32>
    %39 = vector.multi_reduction <add>, %38, %cst_10 [2] : vector<2x8x128xf32> to vector<2x8xf32>
    %40 = vector.shape_cast %39 : vector<2x8xf32> to vector<2x8x1xf32>
    %cst_11 = arith.constant dense<0.000000e+00> : vector<2x1xf32>
    %41 = vector.multi_reduction <add>, %40, %cst_11 [1] : vector<2x8x1xf32> to vector<2x1xf32>
    %42 = vector.shape_cast %41 : vector<2x1xf32> to vector<2x1x1xf32>
    %43 = math.sqrt %42 : vector<2x1x1xf32>
    %cst_12 = arith.constant 9.99999996E-13 : f32
    %44 = vector.broadcast %cst_12 : f32 to vector<2x1x1xf32>
    %45 = arith.maximumf %43, %44 : vector<2x1x1xf32>
    %46 = vector.broadcast %45 : vector<2x1x1xf32> to vector<2x8x128xf32>
    %47 = arith.divf %37, %46 : vector<2x8x128xf32>
    %48 = vector.shape_cast %47 : vector<2x8x128xf32> to vector<2x1024xf32>
    %c0_13 = arith.constant 0 : index
    %c0_14 = arith.constant 0 : index
    %49 = vector.load %arg3[%c0_13, %c0_14] : memref<1024x128xf32, #tpu.memory_space<vmem>>, vector<1024x128xf32>
    %cst_15 = arith.constant dense<0.000000e+00> : vector<2x128xf32>
    %50 = tpu.matmul %48, %49, %cst_15 {dimension_numbers = #tpu.dot_dimension_numbers<[1], [0], [0], [1], [0, 0, 1, 1], [], []>} : vector<2x1024xf32>, vector<1024x128xf32>, vector<2x128xf32> -> vector<2x128xf32>
    %cst_16 = arith.constant dense<0.000000e+00> : vector<2xf32>
    %51 = vector.multi_reduction <add>, %50, %cst_16 [1] : vector<2x128xf32> to vector<2xf32>
    %52 = vector.shape_cast %51 : vector<2xf32> to vector<2x1xf32>
    %53 = arith.mulf %50, %50 : vector<2x128xf32>
    %cst_17 = arith.constant dense<0.000000e+00> : vector<2xf32>
    %54 = vector.multi_reduction <add>, %53, %cst_17 [1] : vector<2x128xf32> to vector<2xf32>
    %55 = vector.shape_cast %54 : vector<2xf32> to vector<2x1xf32>
    %cst_18 = arith.constant 1.280000e+02 : f32
    %56 = vector.broadcast %cst_18 : f32 to vector<2x1xf32>
    %57 = arith.divf %52, %56 : vector<2x1xf32>
    %cst_19 = arith.constant 1.280000e+02 : f32
    %58 = vector.broadcast %cst_19 : f32 to vector<2x1xf32>
    %59 = arith.divf %55, %58 : vector<2x1xf32>
    %60 = arith.mulf %57, %57 : vector<2x1xf32>
    %61 = arith.subf %59, %60 : vector<2x1xf32>
    %62 = vector.broadcast %57 : vector<2x1xf32> to vector<2x128xf32>
    %63 = arith.subf %50, %62 : vector<2x128xf32>
    %cst_20 = arith.constant 9.99999974E-6 : f32
    %64 = vector.broadcast %cst_20 : f32 to vector<2x1xf32>
    %65 = arith.addf %61, %64 : vector<2x1xf32>
    %66 = math.rsqrt %65 : vector<2x1xf32>
    %67 = vector.broadcast %66 : vector<2x1xf32> to vector<2x128xf32>
    %68 = arith.mulf %63, %67 : vector<2x128xf32>
    %c0_21 = arith.constant 0 : index
    %c0_22 = arith.constant 0 : index
    %69 = vector.load %arg4[%c0_21, %c0_22] : memref<1x128xf32, #tpu.memory_space<vmem>>, vector<1x128xf32>
    %70 = vector.broadcast %69 : vector<1x128xf32> to vector<2x128xf32>
    %71 = arith.mulf %68, %70 : vector<2x128xf32>
    %c0_23 = arith.constant 0 : index
    %c0_24 = arith.constant 0 : index
    %72 = vector.load %arg5[%c0_23, %c0_24] : memref<1x128xf32, #tpu.memory_space<vmem>>, vector<1x128xf32>
    %73 = vector.broadcast %72 : vector<1x128xf32> to vector<2x128xf32>
    %74 = arith.addf %71, %73 : vector<2x128xf32>
    %c0_25 = arith.constant 0 : index
    %c0_26 = arith.constant 0 : index
    %75 = vector.load %arg6[%c0_25, %c0_26] : memref<2x128xf32, #tpu.memory_space<vmem>>, vector<2x128xf32>
    tpu.vector_store %arg6[%c0_25, %c0_26], %74 {strides = array<i32>} : memref<2x128xf32, #tpu.memory_space<vmem>>, vector<2x128xf32>,
    return
  }
  func.func @transform_0(%arg0: i32) -> (i32, i32, i32) {
    %c0_i32 = arith.constant 0 : i32
    %c0_i32_0 = arith.constant 0 : i32
    %c0_i32_1 = arith.constant 0 : i32
    return %arg0, %c0_i32, %c0_i32_0 : i32, i32, i32
  }
  func.func @transform_1(%arg0: i32) -> (i32, i32) {
    %c0_i32 = arith.constant 0 : i32
    %c0_i32_0 = arith.constant 0 : i32
    %c0_i32_1 = arith.constant 0 : i32
    return %c0_i32, %c0_i32_0 : i32, i32
  }
  func.func @transform_2(%arg0: i32) -> (i32, i32) {
    %c0_i32 = arith.constant 0 : i32
    %c0_i32_0 = arith.constant 0 : i32
    %c0_i32_1 = arith.constant 0 : i32
    return %c0_i32, %c0_i32_0 : i32, i32
  }
  func.func @transform_3(%arg0: i32) -> (i32, i32) {
    %c0_i32 = arith.constant 0 : i32
    %c0_i32_0 = arith.constant 0 : i32
    %c0_i32_1 = arith.constant 0 : i32
    return %c0_i32, %c0_i32_0 : i32, i32
  }
  func.func @transform_4(%arg0: i32) -> (i32, i32) {
    %c0_i32 = arith.constant 0 : i32
    %c0_i32_0 = arith.constant 0 : i32
    %c0_i32_1 = arith.constant 0 : i32
    return %c0_i32, %c0_i32_0 : i32, i32
  }
  func.func @transform_5(%arg0: i32) -> (i32, i32) {
    %c0_i32 = arith.constant 0 : i32
    %c0_i32_0 = arith.constant 0 : i32
    return %arg0, %c0_i32 : i32, i32
  }
}

</mosaic_0001>

<bundles_post_ra>
// kernel: tpu_custom_call.1
= control target key start
LH: loop header
LB: loop body
LE: loop exit
PB: predicated region body
PF: predicated region fallthrough
CT: control target
= control target key end

     0   :  { %10 = vsyncpa [#allocation3], 0  ;;  %s1073_s0 = inlined_call_operand.hbm [shape: f32[2,128,128], index: 0, kind: input, shape index: {}]   ;;  %s1074_s1 = inlined_call_operand.hbm [shape: f32[8,128], index: 1, kind: input, shape index: {}]   ;;  %s1075_s2 = inlined_call_operand.hbm [shape: f32[1024,128], index: 2, kind: input, shape index: {}]   ;;  %s1076_s3 = inlined_call_operand.vmem [shape: f32[1,128], index: 3, kind: input, shape index: {}]   ;;  %s1077_s4 = inlined_call_operand.vmem [shape: f32[1,128], index: 4, kind: input, shape index: {}]   ;;  %s1078_s5 = inlined_call_operand.hbm [shape: f32[2,128], index: 5, kind: output, shape index: {}]  }
   0x1   :  { %11 = vsyncpa [#allocation6], 0  ;;  %s31_s20 = sshll.u32 %s1074_s1, 4  ;;  %s32_s20 = int_to_ptr.hbm [resolvable:$true] %s31_s20 }
   0x2   :  { %12 = vsyncpa [#allocation4], 0  ;;  %s943_s21 = smov [#allocation5]   ;;  %s17_s25 = sshll.u32 %s1073_s0, 4  ;;  %s18_s25 = int_to_ptr.hbm [resolvable:$true] %s17_s25 }
   0x3   :  { %s33_s22 = sshll.u32 %s943_s21, 4  ;;  %s944_s26 = smov [#allocation2]   ;;  %s34_s22 = int_to_ptr.vmem [resolvable:$true] %s33_s22 }
   0x4   :  { %36 = dma.hbm_to_vmem [thread:$0]  %s32_s20, 128, %s34_s22, [#allocation6]  }
   0x5   :  { %s19_s27 = sshll.u32 %s944_s26, 4  ;;  %s945_s28 = smov 128   ;;  %s20_s27 = int_to_ptr.vmem [resolvable:$true] %s19_s27 }
   0x6   :  { %s946_s29 = smov 8   ;;  %s41_s1 = sshll.u32 %s1075_s2, 4  ;;  %s42_s1 = int_to_ptr.hbm [resolvable:$true] %s41_s1 }
   0x7   :  { %25 = dma.hbm_to_vmem [thread:$0]  %s18_s25, 4096, %s20_s27, [#allocation3], %s945_s28, %s945_s28, %s946_s29  }
   0x8   :  { %s947_s7 = smov [#allocation7]  }
   0x9   :  { %s43_s8 = sshll.u32 %s947_s7, 4  ;;  %s44_s8 = int_to_ptr.vmem [resolvable:$true] %s43_s8 }
   0xa   :  { %49 = dma.hbm_to_vmem [thread:$0]  %s42_s1, 16384, %s44_s8, [#allocation6], %s945_s28, %s945_s28, %s946_s29  }
   0xb   :  { %937 = dma.done.wait [#allocation3], 4096  }
   0xc   :  { %938 = vsyncadd [#allocation3], 4294963200 }
   0xd   :  { %939 = dma.done.wait [#allocation6], 16512  }
   0xe   :  { %940 = vsyncadd [#allocation6], 4294950784  ;;  %v81_v0 = vld [vmem:[#allocation2 + $0x78] sm:$0xff]  ;;  %v80_v2 = vld [vmem:[#allocation2 + $0x70] sm:$0xff]  ;;  %s952_s11 = smov [#allocation8]   ;;  %s781_s15 = sshll.u32 %s1078_s5, 4  ;;  %s782_s15 = int_to_ptr.hbm [resolvable:$true] %s781_s15 }
   0xf   :  { %v97_v1 = vld [vmem:[#allocation2 + $0xf8] sm:$0xff]  ;;  %99 = vmatpush.msra.mxu0 %v81_v0  ;;  %v96_v3 = vld [vmem:[#allocation2 + $0xf0] sm:$0xff]  ;;  %v79_v4 = vld [vmem:[#allocation2 + $0x68] sm:$0xff]  ;;  %206 = vmatpush.xpose.msra.mxu2 %v81_v0  ;;  %s779_s12 = sshll.u32 %s952_s11, 4  ;;  %s780_s12 = int_to_ptr.vmem [resolvable:$true] %s779_s12 }
  0x10   :  { %119 = vmatpush.msra.mxu1 %v97_v1  ;;  %v95_v5 = vld [vmem:[#allocation2 + $0xe8] sm:$0xff]  ;;  %226 = vmatpush.xpose.msra.mxu3 %v97_v1  ;;  %v78_v6 = vld [vmem:[#allocation2 + $0x60] sm:$0xff]  ;;  %v77_v8 = vld [vmem:[#allocation2 + $0x58] sm:$0xff]  ;;  %v199_v1 = vlaneseq }
  0x11   :  { %100 = vmatpush.msra.mxu0 %v80_v2  ;;  %v94_v7 = vld [vmem:[#allocation2 + $0xe0] sm:$0xff]  ;;  %v93_v9 = vld [vmem:[#allocation2 + $0xd8] sm:$0xff]  ;;  %v76_v10 = vld [vmem:[#allocation2 + $0x50] sm:$0xff] }
  0x12   :  { %120 = vmatpush.msra.mxu1 %v96_v3  ;;  %v92_v11 = vld [vmem:[#allocation2 + $0xd0] sm:$0xff]  ;;  %v75_v12 = vld [vmem:[#allocation2 + $0x48] sm:$0xff]  ;;  %v74_v14 = vld [vmem:[#allocation2 + $0x40] sm:$0xff] }
  0x13   :  { %101 = vmatpush.msra.mxu0 %v79_v4  ;;  %207 = vmatpush.xpose.msra.mxu2 %v80_v2  ;;  %v91_v13 = vld [vmem:[#allocation2 + $0xc8] sm:$0xff]  ;;  %v90_v15 = vld [vmem:[#allocation2 + $0xc0] sm:$0xff]  ;;  %v73_v16 = vld [vmem:[#allocation2 + $0x38] sm:$0xff] }
  0x14   :  { %121 = vmatpush.msra.mxu1 %v95_v5  ;;  %227 = vmatpush.xpose.msra.mxu3 %v96_v3  ;;  %v89_v17 = vld [vmem:[#allocation2 + $0xb8] sm:$0xff]  ;;  %v72_v18 = vld [vmem:[#allocation2 + $0x30] sm:$0xff]  ;;  %v71_v20 = vld [vmem:[#allocation2 + $0x28] sm:$0xff] }
  0x15   :  { %102 = vmatpush.msra.mxu0 %v78_v6  ;;  %v88_v19 = vld [vmem:[#allocation2 + $0xb0] sm:$0xff]  ;;  %v87_v21 = vld [vmem:[#allocation2 + $0xa8] sm:$0xff]  ;;  %v70_v22 = vld [vmem:[#allocation2 + $0x20] sm:$0xff] }
  0x16   :  { %122 = vmatpush.msra.mxu1 %v94_v7  ;;  %v86_v23 = vld [vmem:[#allocation2 + $0xa0] sm:$0xff]  ;;  %v69_v24 = vld [vmem:[#allocation2 + $0x18] sm:$0xff]  ;;  %v68_v26 = vld [vmem:[#allocation2 + $0x10] sm:$0xff] }
  0x17   :  { %103 = vmatpush.msra.mxu0 %v77_v8  ;;  %208 = vmatpush.xpose.msra.mxu2 %v79_v4  ;;  %v85_v25 = vld [vmem:[#allocation2 + $0x98] sm:$0xff]  ;;  %v84_v27 = vld [vmem:[#allocation2 + $0x90] sm:$0xff]  ;;  %v67_v28 = vld [vmem:[#allocation2 + $0x8] sm:$0xff] }
  0x18   :  { %123 = vmatpush.msra.mxu1 %v93_v9  ;;  %228 = vmatpush.xpose.msra.mxu3 %v95_v5  ;;  %v83_v29 = vld [vmem:[#allocation2 + $0x88] sm:$0xff]  ;;  %v66_v30 = vld [vmem:[#allocation2] sm:$0xff] }
  0x19   :  { %104 = vmatpush.msra.mxu0 %v76_v10  ;;  %v82_v31 = vld [vmem:[#allocation2 + $0x80] sm:$0xff] }
  0x1a   :  { %124 = vmatpush.msra.mxu1 %v92_v11  ;;  %v992_v32 = vld [vmem:[#allocation5] sm:$0xff] }
  0x1b   :  { %105 = vmatpush.msra.mxu0 %v75_v12  ;;  %209 = vmatpush.xpose.msra.mxu2 %v78_v6  ;;  %v200_v6 = vand.u32 127, %v199_v1 }
  0x1c   :  { %125 = vmatpush.msra.mxu1 %v91_v13  ;;  %229 = vmatpush.xpose.msra.mxu3 %v94_v7 }
  0x1d   :  { %106 = vmatpush.msra.mxu0 %v74_v14  ;;  %vm201_vm2 = vcmp.lt.s32.totalorder %v200_v6, 64 }
  0x1e   :  { %126 = vmatpush.msra.mxu1 %v90_v15 }
  0x1f   :  { %107 = vmatpush.msra.mxu0 %v73_v16  ;;  %210 = vmatpush.xpose.msra.mxu2 %v77_v8 }
  0x20   :  { %127 = vmatpush.msra.mxu1 %v89_v17  ;;  %230 = vmatpush.xpose.msra.mxu3 %v93_v9 }
  0x21   :  { %108 = vmatpush.msra.mxu0 %v72_v18 }
  0x22   :  { %128 = vmatpush.msra.mxu1 %v88_v19 }
  0x23   :  { %109 = vmatpush.msra.mxu0 %v71_v20  ;;  %211 = vmatpush.xpose.msra.mxu2 %v76_v10 }
  0x24   :  { %129 = vmatpush.msra.mxu1 %v87_v21  ;;  %231 = vmatpush.xpose.msra.mxu3 %v92_v11 }
  0x25   :  { %110 = vmatpush.msra.mxu0 %v70_v22 }
  0x26   :  { %130 = vmatpush.msra.mxu1 %v86_v23 }
  0x27   :  { %111 = vmatpush.msra.mxu0 %v69_v24  ;;  %212 = vmatpush.xpose.msra.mxu2 %v75_v12 }
  0x28   :  { %131 = vmatpush.msra.mxu1 %v85_v25  ;;  %232 = vmatpush.xpose.msra.mxu3 %v91_v13 }
  0x29   :  { %112 = vmatpush.msra.mxu0 %v68_v26 }
  0x2a   :  { %132 = vmatpush.msra.mxu1 %v84_v27 }
  0x2b   :  { %113 = vmatpush.msra.mxu0 %v67_v28  ;;  %213 = vmatpush.xpose.msra.mxu2 %v74_v14 }
  0x2c   :  { %133 = vmatpush.msra.mxu1 %v83_v29  ;;  %233 = vmatpush.xpose.msra.mxu3 %v90_v15 }
  0x2d   :  { %114 = vmatpush.msra.mxu0 %v66_v30 }
  0x2e   :  { %134 = vmatpush.msra.mxu1 %v82_v31  ;;  %115 = vmatmul.f32.vlgmr.msra.gmra.mxu0 %v992_v32 }
  0x2f   :  { %135 = vmatmul.f32.vlgmr.msra.gmra.mxu1 %v992_v32  ;;  %214 = vmatpush.xpose.msra.mxu2 %v73_v16 }
  0x30   :  { %234 = vmatpush.xpose.msra.mxu3 %v89_v17 }
  0x33   :  { %215 = vmatpush.xpose.msra.mxu2 %v72_v18 }
  0x34   :  { %235 = vmatpush.xpose.msra.mxu3 %v88_v19 }
  0x37   :  { %216 = vmatpush.xpose.msra.mxu2 %v71_v20 }
  0x38   :  { %236 = vmatpush.xpose.msra.mxu3 %v87_v21  ;;  %v948_v21 = vmov 0.0  }
  0x3b   :  { %217 = vmatpush.xpose.msra.mxu2 %v70_v22  ;;  %v792_v22 = vsel %vm201_vm2, 1.0, %v948_v21 }
  0x3c   :  { %237 = vmatpush.xpose.msra.mxu3 %v86_v23 }
  0x3f   :  { %218 = vmatpush.xpose.msra.mxu2 %v69_v24 }
  0x40   :  { %238 = vmatpush.xpose.msra.mxu3 %v85_v25 }
  0x43   :  { %219 = vmatpush.xpose.msra.mxu2 %v68_v26 }
  0x44   :  { %239 = vmatpush.xpose.msra.mxu3 %v84_v27 }
  0x47   :  { %220 = vmatpush.xpose.msra.mxu2 %v67_v28 }
  0x48   :  { %240 = vmatpush.xpose.msra.mxu3 %v83_v29 }
  0x4b   :  { %221 = vmatpush.xpose.msra.mxu2 %v66_v30 }
  0x4c   :  { %241 = vmatpush.xpose.msra.mxu3 %v82_v31 }
  0xab   :  { %v116_v33 = vpop.f32.mrf.mxu0 }
  0xac   :  { %v136_v34 = vpop.f32.mrf.mxu1  ;;  %v139_v35 = vrot.slane %v116_v33, 4 }
  0xad   :  { %v145_v36 = vrot.slane %v136_v34, 4 }
  0xae   :  { %v140_v37 = vmax.f32 %v116_v33, %v139_v35 }
  0xaf   :  { %v146_v38 = vmax.f32 %v136_v34, %v145_v36 }
  0xb0   :  { %v141_v39 = vrot.slane %v140_v37, 2 }
  0xb1   :  { %v147_v40 = vrot.slane %v146_v38, 2 }
  0xb2   :  { %v142_v41 = vmax.f32 %v140_v37, %v141_v39 }
  0xb3   :  { %v148_v42 = vmax.f32 %v146_v38, %v147_v40 }
  0xb4   :  { %v143_v43 = vrot.slane %v142_v41, 1 }
  0xb5   :  { %v149_v44 = vrot.slane %v148_v42, 1 }
  0xb6   :  { %v144_v45 = vmax.f32 %v142_v41, %v143_v43 }
  0xb7   :  { %v150_v46 = vmax.f32 %v148_v42, %v149_v44 }
  0xb8   :  { %v151_v47 = vsub.f32 %v116_v33, %v144_v45 }
  0xb9   :  { %v152_v48 = vsub.f32 %v136_v34, %v150_v46 }
  0xba   :  { %v153_v49 = vmul.f32 1.442695, %v151_v47 }
  0xbb   :  { %v155_v50 = vmul.f32 1.442695, %v152_v48 }
  0xbc   :  { %813 = vpow2.f32 %v153_v49 }
  0xbd   :  { %815 = vpow2.f32 %v155_v50 }
  0xc2   :  { %v814_v51 = vpop.eup %813 }
  0xc3   :  { %v816_v52 = vpop.eup %815  ;;  %v157_v53 = vrot.slane %v814_v51, 4 }
  0xc4   :  { %v163_v54 = vrot.slane %v816_v52, 4 }
  0xc5   :  { %v158_v55 = vadd.f32 %v814_v51, %v157_v53 }
  0xc6   :  { %v164_v56 = vadd.f32 %v816_v52, %v163_v54 }
  0xc7   :  { %v159_v57 = vrot.slane %v158_v55, 2 }
  0xc8   :  { %v165_v58 = vrot.slane %v164_v56, 2 }
  0xc9   :  { %v160_v59 = vadd.f32 %v159_v57, %v158_v55 }
  0xca   :  { %v166_v60 = vadd.f32 %v165_v58, %v164_v56 }
  0xcb   :  { %v161_v61 = vrot.slane %v160_v59, 1 }
  0xcc   :  { %v167_v62 = vrot.slane %v166_v60, 1 }
  0xcd   :  { %v162_v63 = vadd.f32 %v161_v61, %v160_v59 }
  0xce   :  { %v168_v0 = vadd.f32 %v167_v62, %v166_v60 }
  0xcf   :  { %817 = vrcp.f32 %v162_v63  ;;  %v180_v9 = vand.u32 2147483648, %v162_v63  ;;  %v178_v12 = vand.u32 2147483647, %v162_v63  ;;  %vm174_vm3 = vweird.f32 %v162_v63 }
  0xd0   :  { %819 = vrcp.f32 %v168_v0  ;;  %v195_v10 = vand.u32 2147483648, %v168_v0  ;;  %v193_v14 = vand.u32 2147483647, %v168_v0  ;;  %vm189_vm4 = vweird.f32 %v168_v0 }
  0xd1   :  { %v181_v17 = vor.u32 1.1754944e-38, %v180_v9  ;;  %vm179_vm7 = vcmp.eq.f32.partialorder %v178_v12, 8.507059e+37 }
  0xd2   :  { %v196_v18 = vor.u32 1.1754944e-38, %v195_v10  ;;  %vm194_vm8 = vcmp.eq.f32.partialorder %v193_v14, 8.507059e+37 }
  0xd5   :  { %v818_v2 = vpop.eup %817 }
  0xd6   :  { %v820_v3 = vpop.eup %819  ;;  %v170_v4 = vmul.f32 %v818_v2, %v162_v63  ;;  %vm175_vm0 = vweird.f32 %v818_v2 }
  0xd7   :  { %v185_v5 = vmul.f32 %v820_v3, %v168_v0  ;;  %vm190_vm1 = vweird.f32 %v820_v3  ;;  %vm176_vm5 = vmor %vm174_vm3, %vm175_vm0 }
  0xd8   :  { %v171_v7 = vsub.f32 1.0, %v170_v4  ;;  %vm191_vm6 = vmor %vm189_vm4, %vm190_vm1 }
  0xd9   :  { %v186_v8 = vsub.f32 1.0, %v185_v5 }
  0xda   :  { %v172_v11 = vmul.f32 %v818_v2, %v171_v7 }
  0xdb   :  { %v187_v13 = vmul.f32 %v820_v3, %v186_v8 }
  0xdc   :  { %v173_v15 = vadd.f32 %v818_v2, %v172_v11 }
  0xdd   :  { %v188_v16 = vadd.f32 %v820_v3, %v187_v13 }
  0xde   :  { %v177_v19 = vsel %vm176_vm5, %v818_v2, %v173_v15 }
  0xdf   :  { %v192_v20 = vsel %vm191_vm6, %v820_v3, %v188_v16  ;;  %v182_v23 = vsel %vm179_vm7, %v181_v17, %v177_v19 }
  0xe0   :  { %v197_v24 = vsel %vm194_vm8, %v196_v18, %v192_v20  ;;  %v183_v25 = vmul.f32 %v814_v51, %v182_v23  ;;  %v458_v23 = vld [vmem:[#allocation7 + $0x78] sm:$0xff] }
  0xe1   :  { %v198_v26 = vmul.f32 %v816_v52, %v197_v24  ;;  %571 = vmatpush.msrb.mxu0 %v458_v23  ;;  %v457_v24 = vld [vmem:[#allocation7 + $0x70] sm:$0xff]  ;;  %v535_v23 = vld [vmem:[#allocation7 + $0x2e0] sm:$0xff] }
  0xe2   :  { %v204_v27 = vmul.f32 %v792_v22, %v183_v25  ;;  %v474_v25 = vld [vmem:[#allocation7 + $0xf8] sm:$0xff] }
  0xe3   :  { %v205_v28 = vmul.f32 %v792_v22, %v198_v26  ;;  %572 = vmatpush.msrb.mxu0 %v457_v24  ;;  %591 = vmatpush.msrb.mxu1 %v474_v25  ;;  %v456_v26 = vld [vmem:[#allocation7 + $0x68] sm:$0xff] }
  0xe4   :  { %222 = vmatmul.f32.vlgmr.msra.gmra.mxu2 %v204_v27  ;;  %v484_v25 = vld [vmem:[#allocation7 + $0x148] sm:$0xff] }
  0xe5   :  { %248 = vadd.xlane.f32.xlu0 %v205_v28  ;;  %242 = vmatmul.f32.vlgmr.msra.gmra.mxu3 %v205_v28  ;;  %v455_v28 = vld [vmem:[#allocation7 + $0x60] sm:$0xff] }
  0xe6   :  { %573 = vmatpush.msrb.mxu0 %v456_v26  ;;  %v501_v26 = vld [vmem:[#allocation7 + $0x1d0] sm:$0xff] }
  0xe8   :  { %574 = vmatpush.msrb.mxu0 %v455_v28  ;;  %v534_v28 = vld [vmem:[#allocation7 + $0x2d8] sm:$0xff] }
  0xed   :  { %246 = vadd.xlane.f32.xlu0 %v204_v27  ;;  %v473_v27 = vld [vmem:[#allocation7 + $0xf0] sm:$0xff] }
  0xee   :  { %592 = vmatpush.msrb.mxu1 %v473_v27  ;;  %v517_v27 = vld [vmem:[#allocation7 + $0x250] sm:$0xff] }
 0x158   :  { %v249_v29 = vpop.xlane.xlu0 %248 }
 0x159   :  { %v251_v30 = vmul.f32 %v249_v29, %v992_v32  ;;  %v472_v29 = vld [vmem:[#allocation7 + $0xe8] sm:$0xff] }
 0x15a   :  { %593 = vmatpush.msrb.mxu1 %v472_v29 }
 0x160   :  { %v247_v34 = vpop.xlane.xlu0 %246 }
 0x161   :  { %v250_v37 = vmul.f32 %v247_v34, %v992_v32  ;;  %v470_v34 = vld [vmem:[#allocation7 + $0xd8] sm:$0xff] }
 0x167   :  { %v223_v36 = vpop.f32.mrf.mxu2 }
 0x168   :  { %v243_v31 = vpop.f32.mrf.mxu3  ;;  %v998_v38 = vsub.f32 %v223_v36, %v250_v37  ;;  %v469_v36 = vld [vmem:[#allocation7 + $0xd0] sm:$0xff]  ;;  %v451_v37 = vld [vmem:[#allocation7 + $0x40] sm:$0xff] }
 0x169   :  { %v253_v33 = vsub.f32 %v243_v31, %v251_v30  ;;  %v454_v30 = vld [vmem:[#allocation7 + $0x58] sm:$0xff]  ;;  %v471_v31 = vld [vmem:[#allocation7 + $0xe0] sm:$0xff] }
 0x16a   :  { %v254_v39 = vmul.f32 %v998_v38, %v998_v38  ;;  %575 = vmatpush.msrb.mxu0 %v454_v30  ;;  %594 = vmatpush.msrb.mxu1 %v471_v31  ;;  %v483_v30 = vld [vmem:[#allocation7 + $0x140] sm:$0xff]  ;;  %v500_v31 = vld [vmem:[#allocation7 + $0x1c8] sm:$0xff] }
 0x16b   :  { %v255_v35 = vmul.f32 %v253_v33, %v253_v33 }
 0x16c   :  { %595 = vmatpush.msrb.mxu1 %v470_v34  ;;  %v516_v34 = vld [vmem:[#allocation7 + $0x248] sm:$0xff] }
 0x16d   :  { %258 = vadd.xlane.f32.xlu1 %v255_v35  ;;  %v452_v35 = vld [vmem:[#allocation7 + $0x48] sm:$0xff] }
 0x16e   :  { %596 = vmatpush.msrb.mxu1 %v469_v36 }
 0x175   :  { %256 = vadd.xlane.f32.xlu1 %v254_v39  ;;  %v450_v39 = vld [vmem:[#allocation7 + $0x38] sm:$0xff] }
 0x1e0   :  { %v259_v40 = vpop.xlane.xlu1 %258 }
 0x1e1   :  { %821 = vrsqrt.f32 %v259_v40  ;;  %vm279_vm9 = vcmp.eq.f32.partialorder %v259_v40, inf  ;;  %v282_v51 = vand.u32 2147483648, %v259_v40  ;;  %vm281_vm10 = vcmp.eq.f32.partialorder %v259_v40, 0.0 }
 0x1e7   :  { %v822_v41 = vpop.eup %821 }
 0x1e8   :  { %v273_v42 = vmul.f32 %v822_v41, %v259_v40  ;;  %v257_v43 = vpop.xlane.xlu1 %256 }
 0x1e9   :  { %823 = vrsqrt.f32 %v257_v43  ;;  %vm267_vm11 = vcmp.eq.f32.partialorder %v257_v43, inf  ;;  %v270_v59 = vand.u32 2147483648, %v257_v43  ;;  %vm269_vm12 = vcmp.eq.f32.partialorder %v257_v43, 0.0 }
 0x1ea   :  { %v274_v44 = vmul.f32 %v822_v41, %v273_v42  ;;  %v466_v42 = vld [vmem:[#allocation7 + $0xb8] sm:$0xff] }
 0x1ec   :  { %v275_v45 = vmul.f32 0.5, %v274_v44  ;;  %v465_v44 = vld [vmem:[#allocation7 + $0xb0] sm:$0xff] }
 0x1ee   :  { %v276_v46 = vsub.f32 1.5, %v275_v45  ;;  %v447_v45 = vld [vmem:[#allocation7 + $0x20] sm:$0xff] }
 0x1ef   :  { %v824_v47 = vpop.eup %823 }
 0x1f0   :  { %v277_v48 = vmul.f32 %v822_v41, %v276_v46  ;;  %v261_v49 = vmul.f32 %v824_v47, %v257_v43  ;;  %v449_v41 = vld [vmem:[#allocation7 + $0x30] sm:$0xff]  ;;  %v464_v46 = vld [vmem:[#allocation7 + $0xa8] sm:$0xff] }
 0x1f2   :  { %v278_v32 = vmul.f32 %v277_v48, %v259_v40  ;;  %v262_v50 = vmul.f32 %v824_v47, %v261_v49  ;;  %v463_v48 = vld [vmem:[#allocation7 + $0xa0] sm:$0xff] }
 0x1f4   :  { %v280_v52 = vsel %vm279_vm9, %v259_v40, %v278_v32  ;;  %v263_v53 = vmul.f32 0.5, %v262_v50  ;;  %v467_v40 = vld [vmem:[#allocation7 + $0xc0] sm:$0xff]  ;;  %v445_v50 = vld [vmem:[#allocation7 + $0x10] sm:$0xff] }
 0x1f5   :  { %v283_v54 = vsel %vm281_vm10, %v282_v51, %v280_v52  ;;  %v462_v51 = vld [vmem:[#allocation7 + $0x98] sm:$0xff] }
 0x1f6   :  { %v285_v55 = vmax.f32 %v283_v54, 1e-12  ;;  %v264_v56 = vsub.f32 1.5, %v263_v53  ;;  %v444_v53 = vld [vmem:[#allocation7 + $0x8] sm:$0xff]  ;;  %v461_v54 = vld [vmem:[#allocation7 + $0x90] sm:$0xff] }
 0x1f8   :  { %825 = vrcp.f32 %v285_v55  ;;  %v265_v57 = vmul.f32 %v824_v47, %v264_v56  ;;  %v312_v2 = vand.u32 2147483648, %v285_v55  ;;  %v310_v4 = vand.u32 2147483647, %v285_v55  ;;  %v446_v47 = vld [vmem:[#allocation7 + $0x18] sm:$0xff]  ;;  %v443_v56 = vld [vmem:[#allocation7] sm:$0xff] }
 0x1f9   :  { %vm306_vm14 = vweird.f32 %v285_v55 }
 0x1fa   :  { %v266_v58 = vmul.f32 %v265_v57, %v257_v43  ;;  %v313_v7 = vor.u32 1.1754944e-38, %v312_v2  ;;  %vm311_vm0 = vcmp.eq.f32.partialorder %v310_v4, 8.507059e+37  ;;  %v460_v57 = vld [vmem:[#allocation7 + $0x88] sm:$0xff]  ;;  %v522_v2 = vld [vmem:[#allocation7 + $0x278] sm:$0xff]  ;;  %v505_v4 = vld [vmem:[#allocation7 + $0x1f0] sm:$0xff] }
 0x1fb   :  { %651 = vmatpush.msrb.mxu2 %v522_v2 }
 0x1fc   :  { %v268_v60 = vsel %vm267_vm11, %v257_v43, %v266_v58  ;;  %v448_v43 = vld [vmem:[#allocation7 + $0x28] sm:$0xff]  ;;  %v490_v58 = vld [vmem:[#allocation7 + $0x178] sm:$0xff] }
 0x1fd   :  { %v271_v61 = vsel %vm269_vm12, %v270_v59, %v268_v60  ;;  %v459_v60 = vld [vmem:[#allocation7 + $0x80] sm:$0xff] }
 0x1fe   :  { %v826_v62 = vpop.eup %825  ;;  %v284_v63 = vmax.f32 %v271_v61, 1e-12 }
 0x1ff   :  { %v302_v0 = vmul.f32 %v826_v62, %v285_v55  ;;  %vm307_vm13 = vweird.f32 %v826_v62 }
 0x200   :  { %827 = vrcp.f32 %v284_v63  ;;  %vm308_vm15 = vmor %vm306_vm14, %vm307_vm13  ;;  %v297_v13 = vand.u32 2147483648, %v284_v63  ;;  %v295_v16 = vand.u32 2147483647, %v284_v63  ;;  %vm291_vm2 = vweird.f32 %v284_v63 }
 0x201   :  { %v303_v1 = vsub.f32 1.0, %v302_v0  ;;  %vm391_vm14 = vcmask 1047556  }
 0x202   :  { %v298_v18 = vor.u32 1.1754944e-38, %v297_v13  ;;  %vm296_vm4 = vcmp.eq.f32.partialorder %v295_v16, 8.507059e+37  ;;  %v537_v13 = vld [vmem:[#allocation7 + $0x2f0] sm:$0xff]  ;;  %v519_v16 = vld [vmem:[#allocation7 + $0x260] sm:$0xff] }
 0x203   :  { %v304_v3 = vmul.f32 %v826_v62, %v303_v1 }
 0x205   :  { %v305_v5 = vadd.f32 %v826_v62, %v304_v3  ;;  %v488_v3 = vld [vmem:[#allocation7 + $0x168] sm:$0xff] }
 0x206   :  { %v828_v6 = vpop.eup %827 }
 0x207   :  { %v309_v8 = vsel %vm308_vm15, %v826_v62, %v305_v5  ;;  %v287_v9 = vmul.f32 %v828_v6, %v284_v63  ;;  %vm292_vm1 = vweird.f32 %v828_v6  ;;  %v489_v62 = vld [vmem:[#allocation7 + $0x170] sm:$0xff]  ;;  %v506_v63 = vld [vmem:[#allocation7 + $0x1f8] sm:$0xff] }
 0x208   :  { %v314_v10 = vsel %vm311_vm0, %v313_v7, %v309_v8  ;;  %vm293_vm3 = vmor %vm291_vm2, %vm292_vm1  ;;  %v521_v5 = vld [vmem:[#allocation7 + $0x270] sm:$0xff]  ;;  %v487_v7 = vld [vmem:[#allocation7 + $0x160] sm:$0xff] }
 0x209   :  { %v1002_v11 = vmul.f32 %v314_v10, %v253_v33  ;;  %v288_v12 = vsub.f32 1.0, %v287_v9  ;;  %v453_v33 = vld [vmem:[#allocation7 + $0x50] sm:$0xff]  ;;  %v504_v10 = vld [vmem:[#allocation7 + $0x1e8] sm:$0xff]  ;;  %652 = vmatpush.msrb.mxu2 %v521_v5  ;;  %v527_v5 = vld [vmem:[#allocation7 + $0x2a0] sm:$0xff] }
 0x20a   :  { %576 = vmatpush.msrb.mxu0 %v453_v33  ;;  %vm1043_vm2 = vmneg %vm391_vm14 }
 0x20b   :  { %v317_v14 = vmul.f32 %v1002_v11, %v1002_v11  ;;  %v289_v15 = vmul.f32 %v828_v6, %v288_v12  ;;  %v520_v12 = vld [vmem:[#allocation7 + $0x268] sm:$0xff] }
 0x20c   :  { %577 = vmatpush.msrb.mxu0 %v452_v35  ;;  %653 = vmatpush.msrb.mxu2 %v520_v12  ;;  %v533_v35 = vld [vmem:[#allocation7 + $0x2d0] sm:$0xff] }
 0x20d   :  { %320 = vadd.xlane.f32.xlu2 %v317_v14  ;;  %v290_v17 = vadd.f32 %v828_v6, %v289_v15  ;;  %v486_v14 = vld [vmem:[#allocation7 + $0x158] sm:$0xff]  ;;  %v503_v15 = vld [vmem:[#allocation7 + $0x1e0] sm:$0xff]  ;;  %v509_v12 = vld [vmem:[#allocation7 + $0x210] sm:$0xff] }
 0x20e   :  { %578 = vmatpush.msrb.mxu0 %v451_v37  ;;  %654 = vmatpush.msrb.mxu2 %v519_v16  ;;  %v492_v16 = vld [vmem:[#allocation7 + $0x188] sm:$0xff] }
 0x20f   :  { %v294_v19 = vsel %vm293_vm3, %v828_v6, %v290_v17  ;;  %v538_v6 = vld [vmem:[#allocation7 + $0x2f8] sm:$0xff]  ;;  %v536_v17 = vld [vmem:[#allocation7 + $0x2e8] sm:$0xff]  ;;  %vm731_vm3 = vcmask 1041408  }
 0x210   :  { %v299_v20 = vsel %vm296_vm4, %v298_v18, %v294_v19  ;;  %579 = vmatpush.msrb.mxu0 %v450_v39  ;;  %671 = vmatpush.msrb.mxu3 %v538_v6  ;;  %v485_v19 = vld [vmem:[#allocation7 + $0x150] sm:$0xff]  ;;  %v499_v39 = vld [vmem:[#allocation7 + $0x1c0] sm:$0xff] }
 0x211   :  { %v1007_v21 = vmul.f32 %v299_v20, %v998_v38  ;;  %v468_v38 = vld [vmem:[#allocation7 + $0xc8] sm:$0xff]  ;;  %v502_v20 = vld [vmem:[#allocation7 + $0x1d8] sm:$0xff] }
 0x212   :  { %597 = vmatpush.msrb.mxu1 %v468_v38  ;;  %580 = vmatpush.msrb.mxu0 %v449_v41  ;;  %v482_v38 = vld [vmem:[#allocation7 + $0x138] sm:$0xff]  ;;  %v532_v41 = vld [vmem:[#allocation7 + $0x2c8] sm:$0xff] }
 0x213   :  { %v316_v22 = vmul.f32 %v1007_v21, %v1007_v21  ;;  %672 = vmatpush.msrb.mxu3 %v537_v13  ;;  %v526_v13 = vld [vmem:[#allocation7 + $0x298] sm:$0xff] }
 0x214   :  { %598 = vmatpush.msrb.mxu1 %v467_v40  ;;  %581 = vmatpush.msrb.mxu0 %v448_v43  ;;  %v515_v40 = vld [vmem:[#allocation7 + $0x240] sm:$0xff]  ;;  %v481_v43 = vld [vmem:[#allocation7 + $0x130] sm:$0xff] }
 0x215   :  { %318 = vadd.xlane.f32.xlu2 %v316_v22  ;;  %v518_v22 = vld [vmem:[#allocation7 + $0x258] sm:$0xff]  ;;  %673 = vmatpush.msrb.mxu3 %v536_v17 }
 0x216   :  { %599 = vmatpush.msrb.mxu1 %v466_v42  ;;  %582 = vmatpush.msrb.mxu0 %v447_v45  ;;  %v514_v45 = vld [vmem:[#allocation7 + $0x238] sm:$0xff] }
 0x217   :  { %655 = vmatpush.msrb.mxu2 %v518_v22  ;;  %674 = vmatpush.msrb.mxu3 %v535_v23  ;;  %v491_v22 = vld [vmem:[#allocation7 + $0x180] sm:$0xff] }
 0x218   :  { %600 = vmatpush.msrb.mxu1 %v465_v44  ;;  %583 = vmatpush.msrb.mxu0 %v446_v47  ;;  %v498_v44 = vld [vmem:[#allocation7 + $0x1b8] sm:$0xff] }
 0x219   :  { %656 = vmatpush.msrb.mxu2 %v517_v27  ;;  %675 = vmatpush.msrb.mxu3 %v534_v28  ;;  %v523_v28 = vld [vmem:[#allocation7 + $0x280] sm:$0xff] }
 0x21a   :  { %601 = vmatpush.msrb.mxu1 %v464_v46  ;;  %584 = vmatpush.msrb.mxu0 %v445_v50  ;;  %v531_v46 = vld [vmem:[#allocation7 + $0x2c0] sm:$0xff]  ;;  %v530_v50 = vld [vmem:[#allocation7 + $0x2b8] sm:$0xff] }
 0x21b   :  { %657 = vmatpush.msrb.mxu2 %v516_v34  ;;  %676 = vmatpush.msrb.mxu3 %v533_v35 }
 0x21c   :  { %602 = vmatpush.msrb.mxu1 %v463_v48  ;;  %585 = vmatpush.msrb.mxu0 %v444_v53  ;;  %v480_v48 = vld [vmem:[#allocation7 + $0x128] sm:$0xff] }
 0x21d   :  { %658 = vmatpush.msrb.mxu2 %v515_v40  ;;  %677 = vmatpush.msrb.mxu3 %v532_v41  ;;  %v496_v53 = vld [vmem:[#allocation7 + $0x1a8] sm:$0xff] }
 0x21e   :  { %603 = vmatpush.msrb.mxu1 %v462_v51  ;;  %586 = vmatpush.msrb.mxu0 %v443_v56 }
 0x21f   :  { %659 = vmatpush.msrb.mxu2 %v514_v45  ;;  %678 = vmatpush.msrb.mxu3 %v531_v46 }
 0x220   :  { %604 = vmatpush.msrb.mxu1 %v461_v54  ;;  %611 = vmatpush.msra.mxu0 %v490_v58  ;;  %v512_v54 = vld [vmem:[#allocation7 + $0x228] sm:$0xff]  ;;  %v478_v58 = vld [vmem:[#allocation7 + $0x118] sm:$0xff] }
 0x221   :  { %679 = vmatpush.msrb.mxu3 %v530_v50 }
 0x222   :  { %605 = vmatpush.msrb.mxu1 %v460_v57  ;;  %612 = vmatpush.msra.mxu0 %v489_v62  ;;  %v528_v62 = vld [vmem:[#allocation7 + $0x2a8] sm:$0xff] }
 0x224   :  { %606 = vmatpush.msrb.mxu1 %v459_v60  ;;  %613 = vmatpush.msra.mxu0 %v488_v3 }
 0x226   :  { %631 = vmatpush.msra.mxu1 %v506_v63  ;;  %614 = vmatpush.msra.mxu0 %v487_v7  ;;  %v476_v7 = vld [vmem:[#allocation7 + $0x108] sm:$0xff] }
 0x228   :  { %632 = vmatpush.msra.mxu1 %v505_v4  ;;  %615 = vmatpush.msra.mxu0 %v486_v14  ;;  %v510_v4 = vld [vmem:[#allocation7 + $0x218] sm:$0xff] }
 0x22a   :  { %633 = vmatpush.msra.mxu1 %v504_v10  ;;  %616 = vmatpush.msra.mxu0 %v485_v19  ;;  %v508_v19 = vld [vmem:[#allocation7 + $0x208] sm:$0xff] }
 0x22c   :  { %634 = vmatpush.msra.mxu1 %v503_v15  ;;  %617 = vmatpush.msra.mxu0 %v484_v25  ;;  %v475_v15 = vld [vmem:[#allocation7 + $0x100] sm:$0xff]  ;;  %v524_v25 = vld [vmem:[#allocation7 + $0x288] sm:$0xff] }
 0x22e   :  { %635 = vmatpush.msra.mxu1 %v502_v20  ;;  %618 = vmatpush.msra.mxu0 %v483_v30  ;;  %v525_v20 = vld [vmem:[#allocation7 + $0x290] sm:$0xff] }
 0x230   :  { %636 = vmatpush.msra.mxu1 %v501_v26  ;;  %619 = vmatpush.msra.mxu0 %v482_v38 }
 0x232   :  { %637 = vmatpush.msra.mxu1 %v500_v31  ;;  %620 = vmatpush.msra.mxu0 %v481_v43 }
 0x234   :  { %638 = vmatpush.msra.mxu1 %v499_v39  ;;  %621 = vmatpush.msra.mxu0 %v480_v48 }
 0x236   :  { %639 = vmatpush.msra.mxu1 %v498_v44 }
 0x280   :  { %v321_v49 = vpop.xlane.xlu2 %320 }
 0x281   :  { %v328_v32 = vrot.slane %v321_v49, 4 }
 0x283   :  { %v329_v52 = vadd.f32 %v328_v32, %v321_v49  ;;  %v497_v49 = vld [vmem:[#allocation7 + $0x1b0] sm:$0xff] }
 0x284   :  { %v513_v32 = vld [vmem:[#allocation7 + $0x230] sm:$0xff]  ;;  %640 = vmatpush.msra.mxu1 %v497_v49 }
 0x285   :  { %v330_v55 = vrot.slane %v329_v52, 2  ;;  %660 = vmatpush.msrb.mxu2 %v513_v32 }
 0x286   :  { %641 = vmatpush.msra.mxu1 %v496_v53 }
 0x287   :  { %v331_v59 = vadd.f32 %v330_v55, %v329_v52  ;;  %v479_v52 = vld [vmem:[#allocation7 + $0x120] sm:$0xff]  ;;  %v529_v55 = vld [vmem:[#allocation7 + $0x2b0] sm:$0xff]  ;;  %661 = vmatpush.msrb.mxu2 %v512_v54  ;;  %v950_v54 = vmov 1934713408  }
 0x288   :  { %v319_v61 = vpop.xlane.xlu2 %318  ;;  %622 = vmatpush.msra.mxu0 %v479_v52  ;;  %680 = vmatpush.msrb.mxu3 %v529_v55  ;;  %v416_v55 = vunpack.c.l.s4 %v950_v54 }
 0x289   :  { %v332_v0 = vrot.slane %v331_v59, 1  ;;  %v322_v1 = vrot.slane %v319_v61, 4 }
 0x28a   :  { %623 = vmatpush.msra.mxu0 %v478_v58  ;;  %681 = vmatpush.msrb.mxu3 %v528_v62 }
 0x28b   :  { %v1011_v8 = vadd.f32 %v332_v0, %v331_v59  ;;  %v323_v9 = vadd.f32 %v322_v1, %v319_v61  ;;  %v495_v59 = vld [vmem:[#allocation7 + $0x1a0] sm:$0xff]  ;;  %v477_v0 = vld [vmem:[#allocation7 + $0x110] sm:$0xff]  ;;  %v494_v1 = vld [vmem:[#allocation7 + $0x198] sm:$0xff] }
 0x28c   :  { %v511_v61 = vld [vmem:[#allocation7 + $0x220] sm:$0xff]  ;;  %642 = vmatpush.msra.mxu1 %v495_v59  ;;  %624 = vmatpush.msra.mxu0 %v477_v0 }
 0x28d   :  { %829 = vrsqrt.f32 %v1011_v8  ;;  %v324_v18 = vrot.slane %v323_v9, 2  ;;  %vm353_vm5 = vcmp.eq.f32.partialorder %v1011_v8, inf  ;;  %v356_v2 = vand.u32 2147483648, %v1011_v8  ;;  %662 = vmatpush.msrb.mxu2 %v511_v61  ;;  %682 = vmatpush.msrb.mxu3 %v527_v5  ;;  %v554_v5 = vld [vmem:[#allocation7 + $0x378] sm:$0xff] }
 0x28e   :  { %vm355_vm6 = vcmp.eq.f32.partialorder %v1011_v8, 0.0  ;;  %643 = vmatpush.msra.mxu1 %v494_v1  ;;  %625 = vmatpush.msra.mxu0 %v476_v7 }
 0x28f   :  { %v325_v24 = vadd.f32 %v324_v18, %v323_v9  ;;  %v493_v9 = vld [vmem:[#allocation7 + $0x190] sm:$0xff]  ;;  %663 = vmatpush.msrb.mxu2 %v510_v4  ;;  %683 = vmatpush.msrb.mxu3 %v526_v13 }
 0x290   :  { %644 = vmatpush.msra.mxu1 %v493_v9  ;;  %626 = vmatpush.msra.mxu0 %v475_v15 }
 0x291   :  { %v326_v29 = vrot.slane %v325_v24, 1  ;;  %664 = vmatpush.msrb.mxu2 %v509_v12  ;;  %684 = vmatpush.msrb.mxu3 %v525_v20  ;;  %v570_v12 = vld [vmem:[#allocation7 + $0x3f8] sm:$0xff] }
 0x292   :  { %645 = vmatpush.msra.mxu1 %v492_v16  ;;  %v552_v16 = vld [vmem:[#allocation7 + $0x368] sm:$0xff] }
 0x293   :  { %v830_v33 = vpop.eup %829  ;;  %v1015_v37 = vadd.f32 %v326_v29, %v325_v24  ;;  %665 = vmatpush.msrb.mxu2 %v508_v19  ;;  %v507_v24 = vld [vmem:[#allocation7 + $0x200] sm:$0xff]  ;;  %685 = vmatpush.msrb.mxu3 %v524_v25  ;;  %v568_v19 = vld [vmem:[#allocation7 + $0x3e8] sm:$0xff]  ;;  %v549_v25 = vld [vmem:[#allocation7 + $0x350] sm:$0xff] }
 0x294   :  { %v347_v36 = vmul.f32 %v830_v33, %v1011_v8  ;;  %646 = vmatpush.msra.mxu1 %v491_v22  ;;  %v550_v22 = vld [vmem:[#allocation7 + $0x358] sm:$0xff] }
 0x295   :  { %831 = vrsqrt.f32 %v1015_v37  ;;  %vm341_vm7 = vcmp.eq.f32.partialorder %v1015_v37, inf  ;;  %v344_v26 = vand.u32 2147483648, %v1015_v37  ;;  %666 = vmatpush.msrb.mxu2 %v507_v24  ;;  %vm343_vm8 = vcmp.eq.f32.partialorder %v1015_v37, 0.0  ;;  %686 = vmatpush.msrb.mxu3 %v523_v28  ;;  %v565_v28 = vld [vmem:[#allocation7 + $0x3d0] sm:$0xff] }
 0x296   :  { %v348_v42 = vmul.f32 %v830_v33, %v347_v36 }
 0x298   :  { %v349_v47 = vmul.f32 0.5, %v348_v42  ;;  %v949_v42 = vmov 1983009808  }
 0x299   :  { %v394_v43 = vunpack.c.l.s4 %v949_v42  ;;  %v542_v42 = vld [vmem:[#allocation7 + $0x318] sm:$0xff] }
 0x29a   :  { %v350_v51 = vsub.f32 1.5, %v349_v47 }
 0x29b   :  { %v832_v56 = vpop.eup %831  ;;  %v395_v49 = vunpack.c.0.s8 %v394_v43  ;;  %v559_v43 = vld [vmem:[#allocation7 + $0x3a0] sm:$0xff] }
 0x29c   :  { %v351_v57 = vmul.f32 %v830_v33, %v350_v51  ;;  %v335_v60 = vmul.f32 %v832_v56, %v1015_v37 }
 0x29e   :  { %v352_v63 = vmul.f32 %v351_v57, %v1011_v8  ;;  %v336_v3 = vmul.f32 %v832_v56, %v335_v60  ;;  %v1032_v60 = vunpack.c.0.s8 %v416_v55 }
 0x2a0   :  { %v354_v6 = vsel %vm353_vm5, %v1011_v8, %v352_v63  ;;  %v337_v10 = vmul.f32 0.5, %v336_v3 }
 0x2a1   :  { %v357_v14 = vsel %vm355_vm6, %v356_v2, %v354_v6 }
 0x2a2   :  { %v359_v17 = vmax.f32 %v357_v14, 1e-12  ;;  %v338_v18 = vsub.f32 1.5, %v337_v10  ;;  %v553_v10 = vld [vmem:[#allocation7 + $0x370] sm:$0xff] }
 0x2a4   :  { %833 = vrcp.f32 %v359_v17  ;;  %v339_v8 = vmul.f32 %v832_v56, %v338_v18  ;;  %v386_v35 = vand.u32 2147483648, %v359_v17  ;;  %v384_v38 = vand.u32 2147483647, %v359_v17 }
 0x2a5   :  { %vm380_vm10 = vweird.f32 %v359_v17 }
 0x2a6   :  { %v340_v23 = vmul.f32 %v339_v8, %v1015_v37  ;;  %v387_v41 = vor.u32 1.1754944e-38, %v386_v35  ;;  %vm385_vm12 = vcmp.eq.f32.partialorder %v384_v38, 8.507059e+37  ;;  %v551_v8 = vld [vmem:[#allocation7 + $0x360] sm:$0xff]  ;;  %v562_v35 = vld [vmem:[#allocation7 + $0x3b8] sm:$0xff]  ;;  %v561_v38 = vld [vmem:[#allocation7 + $0x3b0] sm:$0xff] }
 0x2a8   :  { %v342_v27 = vsel %vm341_vm7, %v1015_v37, %v340_v23  ;;  %v567_v23 = vld [vmem:[#allocation7 + $0x3e0] sm:$0xff] }
 0x2a9   :  { %v345_v30 = vsel %vm343_vm8, %v344_v26, %v342_v27  ;;  %v566_v26 = vld [vmem:[#allocation7 + $0x3d8] sm:$0xff]  ;;  %v548_v27 = vld [vmem:[#allocation7 + $0x348] sm:$0xff] }
 0x2aa   :  { %v834_v29 = vpop.eup %833  ;;  %v358_v31 = vmax.f32 %v345_v30, 1e-12  ;;  %v564_v30 = vld [vmem:[#allocation7 + $0x3c8] sm:$0xff] }
 0x2ab   :  { %v376_v33 = vmul.f32 %v834_v29, %v359_v17  ;;  %vm381_vm9 = vweird.f32 %v834_v29  ;;  %v569_v17 = vld [vmem:[#allocation7 + $0x3f0] sm:$0xff] }
 0x2ac   :  { %835 = vrcp.f32 %v358_v31  ;;  %vm382_vm11 = vmor %vm380_vm10, %vm381_vm9  ;;  %v371_v48 = vand.u32 2147483648, %v358_v31  ;;  %v369_v50 = vand.u32 2147483647, %v358_v31  ;;  %vm365_vm15 = vweird.f32 %v358_v31 }
 0x2ad   :  { %v377_v34 = vsub.f32 1.0, %v376_v33  ;;  %v563_v33 = vld [vmem:[#allocation7 + $0x3c0] sm:$0xff] }
 0x2ae   :  { %v372_v53 = vor.u32 1.1754944e-38, %v371_v48  ;;  %vm370_vm1 = vcmp.eq.f32.partialorder %v369_v50, 8.507059e+37  ;;  %v539_v48 = vld [vmem:[#allocation7 + $0x300] sm:$0xff] }
 0x2af   :  { %v378_v36 = vmul.f32 %v834_v29, %v377_v34  ;;  %v545_v34 = vld [vmem:[#allocation7 + $0x330] sm:$0xff]  ;;  %v555_v50 = vld [vmem:[#allocation7 + $0x380] sm:$0xff] }
 0x2b1   :  { %v379_v39 = vadd.f32 %v834_v29, %v378_v36  ;;  %v544_v36 = vld [vmem:[#allocation7 + $0x328] sm:$0xff] }
 0x2b2   :  { %v836_v40 = vpop.eup %835 }
 0x2b3   :  { %v361_v37 = vmul.f32 %v836_v40, %v358_v31  ;;  %v383_v44 = vsel %vm382_vm11, %v834_v29, %v379_v39  ;;  %vm366_vm13 = vweird.f32 %v836_v40  ;;  %v547_v29 = vld [vmem:[#allocation7 + $0x340] sm:$0xff]  ;;  %v546_v31 = vld [vmem:[#allocation7 + $0x338] sm:$0xff] }
 0x2b4   :  { %v388_v45 = vsel %vm385_vm12, %v387_v41, %v383_v44  ;;  %vm367_vm0 = vmor %vm365_vm15, %vm366_vm13  ;;  %v543_v39 = vld [vmem:[#allocation7 + $0x320] sm:$0xff]  ;;  %v558_v44 = vld [vmem:[#allocation7 + $0x398] sm:$0xff] }
 0x2b5   :  { %v362_v46 = vsub.f32 1.0, %v361_v37  ;;  %v389_v47 = vmul.f32 %v388_v45, %v1002_v11  ;;  %v541_v37 = vld [vmem:[#allocation7 + $0x310] sm:$0xff] }
 0x2b7   :  { %v363_v32 = vmul.f32 %v836_v40, %v362_v46  ;;  %v401_v51 = vrot.slane %v389_v47, 4  ;;  %v406_v57 = vperm.slane %v389_v47, %v395_v49  ;;  %v540_v46 = vld [vmem:[#allocation7 + $0x308] sm:$0xff]  ;;  %v557_v47 = vld [vmem:[#allocation7 + $0x390] sm:$0xff] }
 0x2b9   :  { %v364_v52 = vadd.f32 %v836_v40, %v363_v32  ;;  %v402_v58 = vsel %vm391_vm14, 0.0, %v401_v51  ;;  %v411_v63 = vrot.slane %v406_v57, 4 }
 0x2ba   :  { %v1034_v61 = vperm.slane %v402_v58, %v395_v49 }
 0x2bb   :  { %v368_v56 = vsel %vm367_vm0, %v836_v40, %v364_v52  ;;  %v560_v40 = vld [vmem:[#allocation7 + $0x3a8] sm:$0xff] }
 0x2bc   :  { %v373_v59 = vsel %vm370_vm1, %v372_v53, %v368_v56  ;;  %v423_v7 = vrot.slane %v1034_v61, 4 }
 0x2bd   :  { %v374_v11 = vmul.f32 %v373_v59, %v1007_v21 }
 0x2bf   :  { %v396_v62 = vperm.slane %v374_v11, %v395_v49  ;;  %v390_v0 = vrot.slane %v374_v11, 4 }
 0x2c1   :  { %v412_v1 = vsel %vm391_vm14, %v411_v63, %v396_v62  ;;  %v413_v2 = vrot.slane %v396_v62, 4  ;;  %v392_v3 = vsel %vm391_vm14, 0.0, %v390_v0 }
 0x2c2   :  { %v418_v4 = vperm.slane %v412_v1, %v1032_v60  ;;  %v1039_v6 = vperm.slane %v392_v3, %v395_v49  ;;  %v556_v49 = vld [vmem:[#allocation7 + $0x388] sm:$0xff] }
 0x2c3   :  { %v414_v15 = vsel %vm391_vm14, %v406_v57, %v413_v2 }
 0x2c4   :  { %v435_v9 = vrot.slane %v418_v4, 4  ;;  %587 = vmatmul.f32.vlgmr.msrb.gmra.mxu0 %v418_v4  ;;  %v424_v13 = vsel %vm391_vm14, %v423_v7, %v1039_v6  ;;  %v422_v20 = vperm.slane %v414_v15, %v1032_v60  ;;  %v425_v41 = vrot.slane %v1039_v6, 4 }
 0x2c5   :  { %691 = vmatpush.msrb.mxu0 %v554_v5  ;;  %v430_v14 = vperm.slane %v424_v13, %v1032_v60  ;;  %v951_v5 = vmov 128.0  }
 0x2c6   :  { %794 = vmatmul.msk.f32.vlgmr.msrb.gmra.mxu1 %vm1043_vm2, %v435_v9  ;;  %v437_v24 = vrot.slane %v422_v20, 4  ;;  %v426_v45 = vsel %vm391_vm14, %v1034_v61, %v425_v41  ;;  %837 = vrcp.f32 %v951_v5 }
 0x2c7   :  { %692 = vmatpush.msrb.mxu0 %v553_v10  ;;  %711 = vmatpush.msrb.mxu1 %v570_v12  ;;  %v439_v18 = vrot.slane %v430_v14, 4  ;;  %v434_v32 = vperm.slane %v426_v45, %v1032_v60 }
 0x2c8   :  { %667 = vmatmul.f32.vlgmr.msrb.gmra.mxu2 %v430_v14 }
 0x2c9   :  { %693 = vmatpush.msrb.mxu0 %v552_v16  ;;  %712 = vmatpush.msrb.mxu1 %v569_v17  ;;  %v441_v51 = vrot.slane %v434_v32, 4 }
 0x2ca   :  { %798 = vmatmul.msk.f32.vlgmr.msrb.gmra.mxu3 %vm1043_vm2, %v439_v18 }
 0x2cb   :  { %694 = vmatpush.msrb.mxu0 %v551_v8  ;;  %713 = vmatpush.msrb.mxu1 %v568_v19 }
 0x2cc   :  { %627 = vmatmul.f32.vlgmr.msra.gmra.mxu0 %v422_v20  ;;  %v838_v6 = vpop.eup %837 }
 0x2cd   :  { %695 = vmatpush.msrb.mxu0 %v550_v22  ;;  %714 = vmatpush.msrb.mxu1 %v567_v23  ;;  %v740_v7 = vmul.f32 128.0, %v838_v6  ;;  %vm744_vm4 = vweird.f32 %v838_v6 }
 0x2ce   :  { %796 = vmatmul.msk.f32.vlgmr.msra.gmra.mxu1 %vm1043_vm2, %v437_v24 }
 0x2cf   :  { %696 = vmatpush.msrb.mxu0 %v549_v25  ;;  %715 = vmatpush.msrb.mxu1 %v566_v26  ;;  %v741_v21 = vsub.f32 1.0, %v740_v7 }
 0x2d1   :  { %697 = vmatpush.msrb.mxu0 %v548_v27  ;;  %716 = vmatpush.msrb.mxu1 %v565_v28  ;;  %v742_v9 = vmul.f32 %v838_v6, %v741_v21  ;;  %v811_v27 = vld [vmem:[%s1076_s3] ss:$0 sm:$0xff] }
 0x2d3   :  { %698 = vmatpush.msrb.mxu0 %v547_v29  ;;  %717 = vmatpush.msrb.mxu1 %v564_v30  ;;  %v743_v10 = vadd.f32 %v838_v6, %v742_v9  ;;  %v812_v30 = vld [vmem:[%s1077_s4] ss:$0 sm:$0xff] }
 0x2d5   :  { %699 = vmatpush.msrb.mxu0 %v546_v31  ;;  %718 = vmatpush.msrb.mxu1 %v563_v33  ;;  %v745_v12 = vsel %vm744_vm4, %v838_v6, %v743_v10 }
 0x2d7   :  { %700 = vmatpush.msrb.mxu0 %v545_v34  ;;  %719 = vmatpush.msrb.mxu1 %v562_v35 }
 0x2d9   :  { %701 = vmatpush.msrb.mxu0 %v544_v36  ;;  %720 = vmatpush.msrb.mxu1 %v561_v38 }
 0x2db   :  { %702 = vmatpush.msrb.mxu0 %v543_v39  ;;  %721 = vmatpush.msrb.mxu1 %v560_v40 }
 0x2dd   :  { %703 = vmatpush.msrb.mxu0 %v542_v42  ;;  %722 = vmatpush.msrb.mxu1 %v559_v43 }
 0x2df   :  { %704 = vmatpush.msrb.mxu0 %v541_v37  ;;  %723 = vmatpush.msrb.mxu1 %v558_v44 }
 0x2e1   :  { %705 = vmatpush.msrb.mxu0 %v540_v46  ;;  %724 = vmatpush.msrb.mxu1 %v557_v47 }
 0x2e3   :  { %706 = vmatpush.msrb.mxu0 %v539_v48  ;;  %725 = vmatpush.msrb.mxu1 %v556_v49 }
 0x2e4   :  { %707 = vmatmul.f32.vlgmr.msrb.gmra.mxu0 %v434_v32 }
 0x2e5   :  { %726 = vmatpush.msrb.mxu1 %v555_v50 }
 0x2e6   :  { %800 = vmatmul.msk.f32.vlgmr.msrb.gmra.mxu1 %vm1043_vm2, %v441_v51 }
 0x341   :  { %v588_v52 = vpop.f32.mrf.mxu0 }
 0x343   :  { %v608_v53 = vpop.f32.mrf.mxu1 }
 0x344   :  { %v609_v55 = vadd.f32 %v608_v53, %v588_v52 }
 0x349   :  { %v628_v54 = vpop.f32.mrf.mxu0 }
 0x34a   :  { %v629_v56 = vadd.f32 %v628_v54, %v609_v55 }
 0x34b   :  { %v648_v57 = vpop.f32.mrf.mxu1  ;;  %v668_v59 = vpop.f32.mrf.mxu2 }
 0x34c   :  { %v649_v58 = vadd.f32 %v648_v57, %v629_v56 }
 0x34d   :  { %v688_v60 = vpop.f32.mrf.mxu3 }
 0x34e   :  { %v669_v11 = vadd.f32 %v668_v59, %v649_v58 }
 0x350   :  { %v689_v61 = vadd.f32 %v688_v60, %v669_v11 }
 0x361   :  { %v708_v62 = vpop.f32.mrf.mxu0 }
 0x362   :  { %v709_v63 = vadd.f32 %v708_v62, %v689_v61 }
 0x363   :  { %v728_v0 = vpop.f32.mrf.mxu1 }
 0x364   :  { %v729_v1 = vadd.f32 %v728_v0, %v709_v63 }
 0x366   :  { %v732_v2 = vsel %vm731_vm3, %v729_v1, 0.0  ;;  %v735_v3 = vmul.f32 %v729_v1, %v729_v1 }
 0x367   :  { %733 = vadd.xlane.f32.xlu0 %v732_v2 }
 0x368   :  { %v736_v4 = vsel %vm731_vm3, %v735_v3, 0.0 }
 0x369   :  { %737 = vadd.xlane.f32.xlu1 %v736_v4 }
 0x3da   :  { %v734_v13 = vpop.xlane.xlu0 %733 }
 0x3db   :  { %v746_v14 = vmul.f32 %v745_v12, %v734_v13 }
 0x3dc   :  { %v738_v15 = vpop.xlane.xlu1 %737 }
 0x3dd   :  { %v748_v16 = vmul.f32 %v746_v14, %v746_v14  ;;  %v747_v17 = vmul.f32 %v745_v12, %v738_v15  ;;  %v750_v26 = vsub.f32 %v729_v1, %v746_v14 }
 0x3df   :  { %v749_v18 = vsub.f32 %v747_v17, %v748_v16 }
 0x3e1   :  { %v751_v8 = vadd.f32 1e-05, %v749_v18 }
 0x3e3   :  { %839 = vrsqrt.f32 %v751_v8  ;;  %vm758_vm6 = vweird.f32 %v751_v8 }
 0x3e9   :  { %v840_v19 = vpop.eup %839 }
 0x3ea   :  { %v753_v20 = vmul.f32 %v840_v19, %v751_v8  ;;  %vm759_vm5 = vweird.f32 %v840_v19 }
 0x3eb   :  { %vm760_vm7 = vmor %vm758_vm6, %vm759_vm5 }
 0x3ec   :  { %v754_v22 = vmul.f32 %v840_v19, %v753_v20 }
 0x3ee   :  { %v755_v23 = vmul.f32 0.5, %v754_v22 }
 0x3f0   :  { %v756_v24 = vsub.f32 1.5, %v755_v23 }
 0x3f2   :  { %v757_v25 = vmul.f32 %v840_v19, %v756_v24 }
 0x3f4   :  { %v761_v28 = vsel %vm760_vm7, %v840_v19, %v757_v25 }
 0x3f5   :  { %v762_v29 = vmul.f32 %v761_v28, %v750_v26 }
 0x3f7   :  { %v767_v31 = vmul.f32 %v811_v27, %v762_v29 }
 0x3f9   :  { %v772_v33 = vadd.f32 %v812_v30, %v767_v31 }
 0x3fb   :  { %773 = vst [vmem:[#allocation8] sm:$0x3] %v772_v33 }
 0x3fc   :  { %784 = dma.vmem_to_hbm [thread:$0]  %s780_s12, 32, %s782_s15, [#allocation4]  }
 0x3fd   :  { %941 = dma.done.wait [#allocation4], 32  }
 0x3fe   :  { %942 = vsyncadd [#allocation4], 4294967264 }
 0x3ff   :  { %789 = vsyncpa [#allocation3], 1 }
 0x400   :  { %790 = vsyncpa [#allocation6], 1 }
 0x401   :  { %791 = vsyncpa [#allocation4], 1 }

// kernel: tpu_custom_call.1
= control target key start
LH: loop header
LB: loop body
LE: loop exit
PB: predicated region body
PF: predicated region fallthrough
CT: control target
= control target key end

     0   :  { %10 = vsyncpa [#allocation3], 0  ;;  %s1073_s0 = inlined_call_operand.hbm [shape: f32[2,128,128], index: 0, kind: input, shape index: {}]   ;;  %s1074_s1 = inlined_call_operand.hbm [shape: f32[8,128], index: 1, kind: input, shape index: {}]   ;;  %s1075_s2 = inlined_call_operand.hbm [shape: f32[1024,128], index: 2, kind: input, shape index: {}]   ;;  %s1076_s3 = inlined_call_operand.vmem [shape: f32[1,128], index: 3, kind: input, shape index: {}]   ;;  %s1077_s4 = inlined_call_operand.vmem [shape: f32[1,128], index: 4, kind: input, shape index: {}]   ;;  %s1078_s5 = inlined_call_operand.hbm [shape: f32[2,128], index: 5, kind: output, shape index: {}]  }
   0x1   :  { %11 = vsyncpa [#allocation6], 0  ;;  %s31_s20 = sshll.u32 %s1074_s1, 4  ;;  %s32_s20 = int_to_ptr.hbm [resolvable:$true] %s31_s20 }
   0x2   :  { %12 = vsyncpa [#allocation4], 0  ;;  %s943_s21 = smov [#allocation5]   ;;  %s17_s25 = sshll.u32 %s1073_s0, 4  ;;  %s18_s25 = int_to_ptr.hbm [resolvable:$true] %s17_s25 }
   0x3   :  { %s33_s22 = sshll.u32 %s943_s21, 4  ;;  %s944_s26 = smov [#allocation2]   ;;  %s34_s22 = int_to_ptr.vmem [resolvable:$true] %s33_s22 }
   0x4   :  { %36 = dma.hbm_to_vmem [thread:$0]  %s32_s20, 128, %s34_s22, [#allocation6]  }
   0x5   :  { %s19_s27 = sshll.u32 %s944_s26, 4  ;;  %s945_s28 = smov 128   ;;  %s20_s27 = int_to_ptr.vmem [resolvable:$true] %s19_s27 }
   0x6   :  { %s946_s29 = smov 8   ;;  %s41_s1 = sshll.u32 %s1075_s2, 4  ;;  %s42_s1 = int_to_ptr.hbm [resolvable:$true] %s41_s1 }
   0x7   :  { %25 = dma.hbm_to_vmem [thread:$0]  %s18_s25, 4096, %s20_s27, [#allocation3], %s945_s28, %s945_s28, %s946_s29  }
   0x8   :  { %s947_s7 = smov [#allocation7]  }
   0x9   :  { %s43_s8 = sshll.u32 %s947_s7, 4  ;;  %s44_s8 = int_to_ptr.vmem [resolvable:$true] %s43_s8 }
   0xa   :  { %49 = dma.hbm_to_vmem [thread:$0]  %s42_s1, 16384, %s44_s8, [#allocation6], %s945_s28, %s945_s28, %s946_s29  }
   0xb   :  { %937 = dma.done.wait [#allocation3], 4096  }
   0xc   :  { %938 = vsyncadd [#allocation3], 4294963200 }
   0xd   :  { %939 = dma.done.wait [#allocation6], 16512  }
   0xe   :  { %940 = vsyncadd [#allocation6], 4294950784  ;;  %v81_v0 = vld [vmem:[#allocation2 + $0x78] sm:$0xff]  ;;  %v80_v2 = vld [vmem:[#allocation2 + $0x70] sm:$0xff]  ;;  %s952_s11 = smov [#allocation8]   ;;  %s781_s15 = sshll.u32 %s1078_s5, 4  ;;  %s782_s15 = int_to_ptr.hbm [resolvable:$true] %s781_s15 }
   0xf   :  { %v97_v1 = vld [vmem:[#allocation2 + $0xf8] sm:$0xff]  ;;  %99 = vmatpush.msra.mxu0 %v81_v0  ;;  %v96_v3 = vld [vmem:[#allocation2 + $0xf0] sm:$0xff]  ;;  %v79_v4 = vld [vmem:[#allocation2 + $0x68] sm:$0xff]  ;;  %206 = vmatpush.xpose.msra.mxu2 %v81_v0  ;;  %s779_s12 = sshll.u32 %s952_s11, 4  ;;  %s780_s12 = int_to_ptr.vmem [resolvable:$true] %s779_s12 }
  0x10   :  { %119 = vmatpush.msra.mxu1 %v97_v1  ;;  %v95_v5 = vld [vmem:[#allocation2 + $0xe8] sm:$0xff]  ;;  %226 = vmatpush.xpose.msra.mxu3 %v97_v1  ;;  %v78_v6 = vld [vmem:[#allocation2 + $0x60] sm:$0xff]  ;;  %v77_v8 = vld [vmem:[#allocation2 + $0x58] sm:$0xff]  ;;  %v199_v1 = vlaneseq }
  0x11   :  { %100 = vmatpush.msra.mxu0 %v80_v2  ;;  %v94_v7 = vld [vmem:[#allocation2 + $0xe0] sm:$0xff]  ;;  %v93_v9 = vld [vmem:[#allocation2 + $0xd8] sm:$0xff]  ;;  %v76_v10 = vld [vmem:[#allocation2 + $0x50] sm:$0xff] }
  0x12   :  { %120 = vmatpush.msra.mxu1 %v96_v3  ;;  %v92_v11 = vld [vmem:[#allocation2 + $0xd0] sm:$0xff]  ;;  %v75_v12 = vld [vmem:[#allocation2 + $0x48] sm:$0xff]  ;;  %v74_v14 = vld [vmem:[#allocation2 + $0x40] sm:$0xff] }
  0x13   :  { %101 = vmatpush.msra.mxu0 %v79_v4  ;;  %207 = vmatpush.xpose.msra.mxu2 %v80_v2  ;;  %v91_v13 = vld [vmem:[#allocation2 + $0xc8] sm:$0xff]  ;;  %v90_v15 = vld [vmem:[#allocation2 + $0xc0] sm:$0xff]  ;;  %v73_v16 = vld [vmem:[#allocation2 + $0x38] sm:$0xff] }
  0x14   :  { %121 = vmatpush.msra.mxu1 %v95_v5  ;;  %227 = vmatpush.xpose.msra.mxu3 %v96_v3  ;;  %v89_v17 = vld [vmem:[#allocation2 + $0xb8] sm:$0xff]  ;;  %v72_v18 = vld [vmem:[#allocation2 + $0x30] sm:$0xff]  ;;  %v71_v20 = vld [vmem:[#allocation2 + $0x28] sm:$0xff] }
  0x15   :  { %102 = vmatpush.msra.mxu0 %v78_v6  ;;  %v88_v19 = vld [vmem:[#allocation2 + $0xb0] sm:$0xff]  ;;  %v87_v21 = vld [vmem:[#allocation2 + $0xa8] sm:$0xff]  ;;  %v70_v22 = vld [vmem:[#allocation2 + $0x20] sm:$0xff] }
  0x16   :  { %122 = vmatpush.msra.mxu1 %v94_v7  ;;  %v86_v23 = vld [vmem:[#allocation2 + $0xa0] sm:$0xff]  ;;  %v69_v24 = vld [vmem:[#allocation2 + $0x18] sm:$0xff]  ;;  %v68_v26 = vld [vmem:[#allocation2 + $0x10] sm:$0xff] }
  0x17   :  { %103 = vmatpush.msra.mxu0 %v77_v8  ;;  %208 = vmatpush.xpose.msra.mxu2 %v79_v4  ;;  %v85_v25 = vld [vmem:[#allocation2 + $0x98] sm:$0xff]  ;;  %v84_v27 = vld [vmem:[#allocation2 + $0x90] sm:$0xff]  ;;  %v67_v28 = vld [vmem:[#allocation2 + $0x8] sm:$0xff] }
  0x18   :  { %123 = vmatpush.msra.mxu1 %v93_v9  ;;  %228 = vmatpush.xpose.msra.mxu3 %v95_v5  ;;  %v83_v29 = vld [vmem:[#allocation2 + $0x88] sm:$0xff]  ;;  %v66_v30 = vld [vmem:[#allocation2] sm:$0xff] }
  0x19   :  { %104 = vmatpush.msra.mxu0 %v76_v10  ;;  %v82_v31 = vld [vmem:[#allocation2 + $0x80] sm:$0xff] }
  0x1a   :  { %124 = vmatpush.msra.mxu1 %v92_v11  ;;  %v992_v32 = vld [vmem:[#allocation5] sm:$0xff] }
  0x1b   :  { %105 = vmatpush.msra.mxu0 %v75_v12  ;;  %209 = vmatpush.xpose.msra.mxu2 %v78_v6  ;;  %v200_v6 = vand.u32 127, %v199_v1 }
  0x1c   :  { %125 = vmatpush.msra.mxu1 %v91_v13  ;;  %229 = vmatpush.xpose.msra.mxu3 %v94_v7 }
  0x1d   :  { %106 = vmatpush.msra.mxu0 %v74_v14  ;;  %vm201_vm2 = vcmp.lt.s32.totalorder %v200_v6, 64 }
  0x1e   :  { %126 = vmatpush.msra.mxu1 %v90_v15 }
  0x1f   :  { %107 = vmatpush.msra.mxu0 %v73_v16  ;;  %210 = vmatpush.xpose.msra.mxu2 %v77_v8 }
  0x20   :  { %127 = vmatpush.msra.mxu1 %v89_v17  ;;  %230 = vmatpush.xpose.msra.mxu3 %v93_v9 }
  0x21   :  { %108 = vmatpush.msra.mxu0 %v72_v18 }
  0x22   :  { %128 = vmatpush.msra.mxu1 %v88_v19 }
  0x23   :  { %109 = vmatpush.msra.mxu0 %v71_v20  ;;  %211 = vmatpush.xpose.msra.mxu2 %v76_v10 }
  0x24   :  { %129 = vmatpush.msra.mxu1 %v87_v21  ;;  %231 = vmatpush.xpose.msra.mxu3 %v92_v11 }
  0x25   :  { %110 = vmatpush.msra.mxu0 %v70_v22 }
  0x26   :  { %130 = vmatpush.msra.mxu1 %v86_v23 }
  0x27   :  { %111 = vmatpush.msra.mxu0 %v69_v24  ;;  %212 = vmatpush.xpose.msra.mxu2 %v75_v12 }
  0x28   :  { %131 = vmatpush.msra.mxu1 %v85_v25  ;;  %232 = vmatpush.xpose.msra.mxu3 %v91_v13 }
  0x29   :  { %112 = vmatpush.msra.mxu0 %v68_v26 }
  0x2a   :  { %132 = vmatpush.msra.mxu1 %v84_v27 }
  0x2b   :  { %113 = vmatpush.msra.mxu0 %v67_v28  ;;  %213 = vmatpush.xpose.msra.mxu2 %v74_v14 }
  0x2c   :  { %133 = vmatpush.msra.mxu1 %v83_v29  ;;  %233 = vmatpush.xpose.msra.mxu3 %v90_v15 }
  0x2d   :  { %114 = vmatpush.msra.mxu0 %v66_v30 }
  0x2e   :  { %134 = vmatpush.msra.mxu1 %v82_v31  ;;  %115 = vmatmul.f32.vlgmr.msra.gmra.mxu0 %v992_v32 }
  0x2f   :  { %135 = vmatmul.f32.vlgmr.msra.gmra.mxu1 %v992_v32  ;;  %214 = vmatpush.xpose.msra.mxu2 %v73_v16 }
  0x30   :  { %234 = vmatpush.xpose.msra.mxu3 %v89_v17 }
  0x33   :  { %215 = vmatpush.xpose.msra.mxu2 %v72_v18 }
  0x34   :  { %235 = vmatpush.xpose.msra.mxu3 %v88_v19 }
  0x37   :  { %216 = vmatpush.xpose.msra.mxu2 %v71_v20 }
  0x38   :  { %236 = vmatpush.xpose.msra.mxu3 %v87_v21  ;;  %v948_v21 = vmov 0.0  }
  0x3b   :  { %217 = vmatpush.xpose.msra.mxu2 %v70_v22  ;;  %v792_v22 = vsel %vm201_vm2, 1.0, %v948_v21 }
  0x3c   :  { %237 = vmatpush.xpose.msra.mxu3 %v86_v23 }
  0x3f   :  { %218 = vmatpush.xpose.msra.mxu2 %v69_v24 }
  0x40   :  { %238 = vmatpush.xpose.msra.mxu3 %v85_v25 }
  0x43   :  { %219 = vmatpush.xpose.msra.mxu2 %v68_v26 }
  0x44   :  { %239 = vmatpush.xpose.msra.mxu3 %v84_v27 }
  0x47   :  { %220 = vmatpush.xpose.msra.mxu2 %v67_v28 }
  0x48   :  { %240 = vmatpush.xpose.msra.mxu3 %v83_v29 }
  0x4b   :  { %221 = vmatpush.xpose.msra.mxu2 %v66_v30 }
  0x4c   :  { %241 = vmatpush.xpose.msra.mxu3 %v82_v31 }
  0xab   :  { %v116_v33 = vpop.f32.mrf.mxu0 }
  0xac   :  { %v136_v34 = vpop.f32.mrf.mxu1  ;;  %v139_v35 = vrot.slane %v116_v33, 4 }
  0xad   :  { %v145_v36 = vrot.slane %v136_v34, 4 }
  0xae   :  { %v140_v37 = vmax.f32 %v116_v33, %v139_v35 }
  0xaf   :  { %v146_v38 = vmax.f32 %v136_v34, %v145_v36 }
  0xb0   :  { %v141_v39 = vrot.slane %v140_v37, 2 }
  0xb1   :  { %v147_v40 = vrot.slane %v146_v38, 2 }
  0xb2   :  { %v142_v41 = vmax.f32 %v140_v37, %v141_v39 }
  0xb3   :  { %v148_v42 = vmax.f32 %v146_v38, %v147_v40 }
  0xb4   :  { %v143_v43 = vrot.slane %v142_v41, 1 }
  0xb5   :  { %v149_v44 = vrot.slane %v148_v42, 1 }
  0xb6   :  { %v144_v45 = vmax.f32 %v142_v41, %v143_v43 }
  0xb7   :  { %v150_v46 = vmax.f32 %v148_v42, %v149_v44 }
  0xb8   :  { %v151_v47 = vsub.f32 %v116_v33, %v144_v45 }
  0xb9   :  { %v152_v48 = vsub.f32 %v136_v34, %v150_v46 }
  0xba   :  { %v153_v49 = vmul.f32 1.442695, %v151_v47 }
  0xbb   :  { %v155_v50 = vmul.f32 1.442695, %v152_v48 }
  0xbc   :  { %813 = vpow2.f32 %v153_v49 }
  0xbd   :  { %815 = vpow2.f32 %v155_v50 }
  0xc2   :  { %v814_v51 = vpop.eup %813 }
  0xc3   :  { %v816_v52 = vpop.eup %815  ;;  %v157_v53 = vrot.slane %v814_v51, 4 }
  0xc4   :  { %v163_v54 = vrot.slane %v816_v52, 4 }
  0xc5   :  { %v158_v55 = vadd.f32 %v814_v51, %v157_v53 }
  0xc6   :  { %v164_v56 = vadd.f32 %v816_v52, %v163_v54 }
  0xc7   :  { %v159_v57 = vrot.slane %v158_v55, 2 }
  0xc8   :  { %v165_v58 = vrot.slane %v164_v56, 2 }
  0xc9   :  { %v160_v59 = vadd.f32 %v159_v57, %v158_v55 }
  0xca   :  { %v166_v60 = vadd.f32 %v165_v58, %v164_v56 }
  0xcb   :  { %v161_v61 = vrot.slane %v160_v59, 1 }
  0xcc   :  { %v167_v62 = vrot.slane %v166_v60, 1 }
  0xcd   :  { %v162_v63 = vadd.f32 %v161_v61, %v160_v59 }
  0xce   :  { %v168_v0 = vadd.f32 %v167_v62, %v166_v60 }
  0xcf   :  { %817 = vrcp.f32 %v162_v63  ;;  %v180_v9 = vand.u32 2147483648, %v162_v63  ;;  %v178_v12 = vand.u32 2147483647, %v162_v63  ;;  %vm174_vm3 = vweird.f32 %v162_v63 }
  0xd0   :  { %819 = vrcp.f32 %v168_v0  ;;  %v195_v10 = vand.u32 2147483648, %v168_v0  ;;  %v193_v14 = vand.u32 2147483647, %v168_v0  ;;  %vm189_vm4 = vweird.f32 %v168_v0 }
  0xd1   :  { %v181_v17 = vor.u32 1.1754944e-38, %v180_v9  ;;  %vm179_vm7 = vcmp.eq.f32.partialorder %v178_v12, 8.507059e+37 }
  0xd2   :  { %v196_v18 = vor.u32 1.1754944e-38, %v195_v10  ;;  %vm194_vm8 = vcmp.eq.f32.partialorder %v193_v14, 8.507059e+37 }
  0xd5   :  { %v818_v2 = vpop.eup %817 }
  0xd6   :  { %v820_v3 = vpop.eup %819  ;;  %v170_v4 = vmul.f32 %v818_v2, %v162_v63  ;;  %vm175_vm0 = vweird.f32 %v818_v2 }
  0xd7   :  { %v185_v5 = vmul.f32 %v820_v3, %v168_v0  ;;  %vm190_vm1 = vweird.f32 %v820_v3  ;;  %vm176_vm5 = vmor %vm174_vm3, %vm175_vm0 }
  0xd8   :  { %v171_v7 = vsub.f32 1.0, %v170_v4  ;;  %vm191_vm6 = vmor %vm189_vm4, %vm190_vm1 }
  0xd9   :  { %v186_v8 = vsub.f32 1.0, %v185_v5 }
  0xda   :  { %v172_v11 = vmul.f32 %v818_v2, %v171_v7 }
  0xdb   :  { %v187_v13 = vmul.f32 %v820_v3, %v186_v8 }
  0xdc   :  { %v173_v15 = vadd.f32 %v818_v2, %v172_v11 }
  0xdd   :  { %v188_v16 = vadd.f32 %v820_v3, %v187_v13 }
  0xde   :  { %v177_v19 = vsel %vm176_vm5, %v818_v2, %v173_v15 }
  0xdf   :  { %v192_v20 = vsel %vm191_vm6, %v820_v3, %v188_v16  ;;  %v182_v23 = vsel %vm179_vm7, %v181_v17, %v177_v19 }
  0xe0   :  { %v197_v24 = vsel %vm194_vm8, %v196_v18, %v192_v20  ;;  %v183_v25 = vmul.f32 %v814_v51, %v182_v23  ;;  %v458_v23 = vld [vmem:[#allocation7 + $0x78] sm:$0xff] }
  0xe1   :  { %v198_v26 = vmul.f32 %v816_v52, %v197_v24  ;;  %571 = vmatpush.msrb.mxu0 %v458_v23  ;;  %v457_v24 = vld [vmem:[#allocation7 + $0x70] sm:$0xff]  ;;  %v535_v23 = vld [vmem:[#allocation7 + $0x2e0] sm:$0xff] }
  0xe2   :  { %v204_v27 = vmul.f32 %v792_v22, %v183_v25  ;;  %v474_v25 = vld [vmem:[#allocation7 + $0xf8] sm:$0xff] }
  0xe3   :  { %v205_v28 = vmul.f32 %v792_v22, %v198_v26  ;;  %572 = vmatpush.msrb.mxu0 %v457_v24  ;;  %591 = vmatpush.msrb.mxu1 %v474_v25  ;;  %v456_v26 = vld [vmem:[#allocation7 + $0x68] sm:$0xff] }
  0xe4   :  { %222 = vmatmul.f32.vlgmr.msra.gmra.mxu2 %v204_v27  ;;  %v484_v25 = vld [vmem:[#allocation7 + $0x148] sm:$0xff] }
  0xe5   :  { %248 = vadd.xlane.f32.xlu0 %v205_v28  ;;  %242 = vmatmul.f32.vlgmr.msra.gmra.mxu3 %v205_v28  ;;  %v455_v28 = vld [vmem:[#allocation7 + $0x60] sm:$0xff] }
  0xe6   :  { %573 = vmatpush.msrb.mxu0 %v456_v26  ;;  %v501_v26 = vld [vmem:[#allocation7 + $0x1d0] sm:$0xff] }
  0xe8   :  { %574 = vmatpush.msrb.mxu0 %v455_v28  ;;  %v534_v28 = vld [vmem:[#allocation7 + $0x2d8] sm:$0xff] }
  0xed   :  { %246 = vadd.xlane.f32.xlu0 %v204_v27  ;;  %v473_v27 = vld [vmem:[#allocation7 + $0xf0] sm:$0xff] }
  0xee   :  { %592 = vmatpush.msrb.mxu1 %v473_v27  ;;  %v517_v27 = vld [vmem:[#allocation7 + $0x250] sm:$0xff] }
 0x158   :  { %v249_v29 = vpop.xlane.xlu0 %248 }
 0x159   :  { %v251_v30 = vmul.f32 %v249_v29, %v992_v32  ;;  %v472_v29 = vld [vmem:[#allocation7 + $0xe8] sm:$0xff] }
 0x15a   :  { %593 = vmatpush.msrb.mxu1 %v472_v29 }
 0x160   :  { %v247_v34 = vpop.xlane.xlu0 %246 }
 0x161   :  { %v250_v37 = vmul.f32 %v247_v34, %v992_v32  ;;  %v470_v34 = vld [vmem:[#allocation7 + $0xd8] sm:$0xff] }
 0x167   :  { %v223_v36 = vpop.f32.mrf.mxu2 }
 0x168   :  { %v243_v31 = vpop.f32.mrf.mxu3  ;;  %v998_v38 = vsub.f32 %v223_v36, %v250_v37  ;;  %v469_v36 = vld [vmem:[#allocation7 + $0xd0] sm:$0xff]  ;;  %v451_v37 = vld [vmem:[#allocation7 + $0x40] sm:$0xff] }
 0x169   :  { %v253_v33 = vsub.f32 %v243_v31, %v251_v30  ;;  %v454_v30 = vld [vmem:[#allocation7 + $0x58] sm:$0xff]  ;;  %v471_v31 = vld [vmem:[#allocation7 + $0xe0] sm:$0xff] }
 0x16a   :  { %v254_v39 = vmul.f32 %v998_v38, %v998_v38  ;;  %575 = vmatpush.msrb.mxu0 %v454_v30  ;;  %594 = vmatpush.msrb.mxu1 %v471_v31  ;;  %v483_v30 = vld [vmem:[#allocation7 + $0x140] sm:$0xff]  ;;  %v500_v31 = vld [vmem:[#allocation7 + $0x1c8] sm:$0xff] }
 0x16b   :  { %v255_v35 = vmul.f32 %v253_v33, %v253_v33 }
 0x16c   :  { %595 = vmatpush.msrb.mxu1 %v470_v34  ;;  %v516_v34 = vld [vmem:[#allocation7 + $0x248] sm:$0xff] }
 0x16d   :  { %258 = vadd.xlane.f32.xlu1 %v255_v35  ;;  %v452_v35 = vld [vmem:[#allocation7 + $0x48] sm:$0xff] }
 0x16e   :  { %596 = vmatpush.msrb.mxu1 %v469_v36 }
 0x175   :  { %256 = vadd.xlane.f32.xlu1 %v254_v39  ;;  %v450_v39 = vld [vmem:[#allocation7 + $0x38] sm:$0xff] }
 0x1e0   :  { %v259_v40 = vpop.xlane.xlu1 %258 }
 0x1e1   :  { %821 = vrsqrt.f32 %v259_v40  ;;  %vm279_vm9 = vcmp.eq.f32.partialorder %v259_v40, inf  ;;  %v282_v51 = vand.u32 2147483648, %v259_v40  ;;  %vm281_vm10 = vcmp.eq.f32.partialorder %v259_v40, 0.0 }
 0x1e7   :  { %v822_v41 = vpop.eup %821 }
 0x1e8   :  { %v273_v42 = vmul.f32 %v822_v41, %v259_v40  ;;  %v257_v43 = vpop.xlane.xlu1 %256 }
 0x1e9   :  { %823 = vrsqrt.f32 %v257_v43  ;;  %vm267_vm11 = vcmp.eq.f32.partialorder %v257_v43, inf  ;;  %v270_v59 = vand.u32 2147483648, %v257_v43  ;;  %vm269_vm12 = vcmp.eq.f32.partialorder %v257_v43, 0.0 }
 0x1ea   :  { %v274_v44 = vmul.f32 %v822_v41, %v273_v42  ;;  %v466_v42 = vld [vmem:[#allocation7 + $0xb8] sm:$0xff] }
 0x1ec   :  { %v275_v45 = vmul.f32 0.5, %v274_v44  ;;  %v465_v44 = vld [vmem:[#allocation7 + $0xb0] sm:$0xff] }
 0x1ee   :  { %v276_v46 = vsub.f32 1.5, %v275_v45  ;;  %v447_v45 = vld [vmem:[#allocation7 + $0x20] sm:$0xff] }
 0x1ef   :  { %v824_v47 = vpop.eup %823 }
 0x1f0   :  { %v277_v48 = vmul.f32 %v822_v41, %v276_v46  ;;  %v261_v49 = vmul.f32 %v824_v47, %v257_v43  ;;  %v449_v41 = vld [vmem:[#allocation7 + $0x30] sm:$0xff]  ;;  %v464_v46 = vld [vmem:[#allocation7 + $0xa8] sm:$0xff] }
 0x1f2   :  { %v278_v32 = vmul.f32 %v277_v48, %v259_v40  ;;  %v262_v50 = vmul.f32 %v824_v47, %v261_v49  ;;  %v463_v48 = vld [vmem:[#allocation7 + $0xa0] sm:$0xff] }
 0x1f4   :  { %v280_v52 = vsel %vm279_vm9, %v259_v40, %v278_v32  ;;  %v263_v53 = vmul.f32 0.5, %v262_v50  ;;  %v467_v40 = vld [vmem:[#allocation7 + $0xc0] sm:$0xff]  ;;  %v445_v50 = vld [vmem:[#allocation7 + $0x10] sm:$0xff] }
 0x1f5   :  { %v283_v54 = vsel %vm281_vm10, %v282_v51, %v280_v52  ;;  %v462_v51 = vld [vmem:[#allocation7 + $0x98] sm:$0xff] }
 0x1f6   :  { %v285_v55 = vmax.f32 %v283_v54, 1e-12  ;;  %v264_v56 = vsub.f32 1.5, %v263_v53  ;;  %v444_v53 = vld [vmem:[#allocation7 + $0x8] sm:$0xff]  ;;  %v461_v54 = vld [vmem:[#allocation7 + $0x90] sm:$0xff] }
 0x1f8   :  { %825 = vrcp.f32 %v285_v55  ;;  %v265_v57 = vmul.f32 %v824_v47, %v264_v56  ;;  %v312_v2 = vand.u32 2147483648, %v285_v55  ;;  %v310_v4 = vand.u32 2147483647, %v285_v55  ;;  %v446_v47 = vld [vmem:[#allocation7 + $0x18] sm:$0xff]  ;;  %v443_v56 = vld [vmem:[#allocation7] sm:$0xff] }
 0x1f9   :  { %vm306_vm14 = vweird.f32 %v285_v55 }
 0x1fa   :  { %v266_v58 = vmul.f32 %v265_v57, %v257_v43  ;;  %v313_v7 = vor.u32 1.1754944e-38, %v312_v2  ;;  %vm311_vm0 = vcmp.eq.f32.partialorder %v310_v4, 8.507059e+37  ;;  %v460_v57 = vld [vmem:[#allocation7 + $0x88] sm:$0xff]  ;;  %v522_v2 = vld [vmem:[#allocation7 + $0x278] sm:$0xff]  ;;  %v505_v4 = vld [vmem:[#allocation7 + $0x1f0] sm:$0xff] }
 0x1fb   :  { %651 = vmatpush.msrb.mxu2 %v522_v2 }
 0x1fc   :  { %v268_v60 = vsel %vm267_vm11, %v257_v43, %v266_v58  ;;  %v448_v43 = vld [vmem:[#allocation7 + $0x28] sm:$0xff]  ;;  %v490_v58 = vld [vmem:[#allocation7 + $0x178] sm:$0xff] }
 0x1fd   :  { %v271_v61 = vsel %vm269_vm12, %v270_v59, %v268_v60  ;;  %v459_v60 = vld [vmem:[#allocation7 + $0x80] sm:$0xff] }
 0x1fe   :  { %v826_v62 = vpop.eup %825  ;;  %v284_v63 = vmax.f32 %v271_v61, 1e-12 }
 0x1ff   :  { %v302_v0 = vmul.f32 %v826_v62, %v285_v55  ;;  %vm307_vm13 = vweird.f32 %v826_v62 }
 0x200   :  { %827 = vrcp.f32 %v284_v63  ;;  %vm308_vm15 = vmor %vm306_vm14, %vm307_vm13  ;;  %v297_v13 = vand.u32 2147483648, %v284_v63  ;;  %v295_v16 = vand.u32 2147483647, %v284_v63  ;;  %vm291_vm2 = vweird.f32 %v284_v63 }
 0x201   :  { %v303_v1 = vsub.f32 1.0, %v302_v0  ;;  %vm391_vm14 = vcmask 1047556  }
 0x202   :  { %v298_v18 = vor.u32 1.1754944e-38, %v297_v13  ;;  %vm296_vm4 = vcmp.eq.f32.partialorder %v295_v16, 8.507059e+37  ;;  %v537_v13 = vld [vmem:[#allocation7 + $0x2f0] sm:$0xff]  ;;  %v519_v16 = vld [vmem:[#allocation7 + $0x260] sm:$0xff] }
 0x203   :  { %v304_v3 = vmul.f32 %v826_v62, %v303_v1 }
 0x205   :  { %v305_v5 = vadd.f32 %v826_v62, %v304_v3  ;;  %v488_v3 = vld [vmem:[#allocation7 + $0x168] sm:$0xff] }
 0x206   :  { %v828_v6 = vpop.eup %827 }
 0x207   :  { %v309_v8 = vsel %vm308_vm15, %v826_v62, %v305_v5  ;;  %v287_v9 = vmul.f32 %v828_v6, %v284_v63  ;;  %vm292_vm1 = vweird.f32 %v828_v6  ;;  %v489_v62 = vld [vmem:[#allocation7 + $0x170] sm:$0xff]  ;;  %v506_v63 = vld [vmem:[#allocation7 + $0x1f8] sm:$0xff] }
 0x208   :  { %v314_v10 = vsel %vm311_vm0, %v313_v7, %v309_v8  ;;  %vm293_vm3 = vmor %vm291_vm2, %vm292_vm1  ;;  %v521_v5 = vld [vmem:[#allocation7 + $0x270] sm:$0xff]  ;;  %v487_v7 = vld [vmem:[#allocation7 + $0x160] sm:$0xff] }
 0x209   :  { %v1002_v11 = vmul.f32 %v314_v10, %v253_v33  ;;  %v288_v12 = vsub.f32 1.0, %v287_v9  ;;  %v453_v33 = vld [vmem:[#allocation7 + $0x50] sm:$0xff]  ;;  %v504_v10 = vld [vmem:[#allocation7 + $0x1e8] sm:$0xff]  ;;  %652 = vmatpush.msrb.mxu2 %v521_v5  ;;  %v527_v5 = vld [vmem:[#allocation7 + $0x2a0] sm:$0xff] }
 0x20a   :  { %576 = vmatpush.msrb.mxu0 %v453_v33  ;;  %vm1043_vm2 = vmneg %vm391_vm14 }
 0x20b   :  { %v317_v14 = vmul.f32 %v1002_v11, %v1002_v11  ;;  %v289_v15 = vmul.f32 %v828_v6, %v288_v12  ;;  %v520_v12 = vld [vmem:[#allocation7 + $0x268] sm:$0xff] }
 0x20c   :  { %577 = vmatpush.msrb.mxu0 %v452_v35  ;;  %653 = vmatpush.msrb.mxu2 %v520_v12  ;;  %v533_v35 = vld [vmem:[#allocation7 + $0x2d0] sm:$0xff] }
 0x20d   :  { %320 = vadd.xlane.f32.xlu2 %v317_v14  ;;  %v290_v17 = vadd.f32 %v828_v6, %v289_v15  ;;  %v486_v14 = vld [vmem:[#allocation7 + $0x158] sm:$0xff]  ;;  %v503_v15 = vld [vmem:[#allocation7 + $0x1e0] sm:$0xff]  ;;  %v509_v12 = vld [vmem:[#allocation7 + $0x210] sm:$0xff] }
 0x20e   :  { %578 = vmatpush.msrb.mxu0 %v451_v37  ;;  %654 = vmatpush.msrb.mxu2 %v519_v16  ;;  %v492_v16 = vld [vmem:[#allocation7 + $0x188] sm:$0xff] }
 0x20f   :  { %v294_v19 = vsel %vm293_vm3, %v828_v6, %v290_v17  ;;  %v538_v6 = vld [vmem:[#allocation7 + $0x2f8] sm:$0xff]  ;;  %v536_v17 = vld [vmem:[#allocation7 + $0x2e8] sm:$0xff]  ;;  %vm731_vm3 = vcmask 1041408  }
 0x210   :  { %v299_v20 = vsel %vm296_vm4, %v298_v18, %v294_v19  ;;  %579 = vmatpush.msrb.mxu0 %v450_v39  ;;  %671 = vmatpush.msrb.mxu3 %v538_v6  ;;  %v485_v19 = vld [vmem:[#allocation7 + $0x150] sm:$0xff]  ;;  %v499_v39 = vld [vmem:[#allocation7 + $0x1c0] sm:$0xff] }
 0x211   :  { %v1007_v21 = vmul.f32 %v299_v20, %v998_v38  ;;  %v468_v38 = vld [vmem:[#allocation7 + $0xc8] sm:$0xff]  ;;  %v502_v20 = vld [vmem:[#allocation7 + $0x1d8] sm:$0xff] }
 0x212   :  { %597 = vmatpush.msrb.mxu1 %v468_v38  ;;  %580 = vmatpush.msrb.mxu0 %v449_v41  ;;  %v482_v38 = vld [vmem:[#allocation7 + $0x138] sm:$0xff]  ;;  %v532_v41 = vld [vmem:[#allocation7 + $0x2c8] sm:$0xff] }
 0x213   :  { %v316_v22 = vmul.f32 %v1007_v21, %v1007_v21  ;;  %672 = vmatpush.msrb.mxu3 %v537_v13  ;;  %v526_v13 = vld [vmem:[#allocation7 + $0x298] sm:$0xff] }
 0x214   :  { %598 = vmatpush.msrb.mxu1 %v467_v40  ;;  %581 = vmatpush.msrb.mxu0 %v448_v43  ;;  %v515_v40 = vld [vmem:[#allocation7 + $0x240] sm:$0xff]  ;;  %v481_v43 = vld [vmem:[#allocation7 + $0x130] sm:$0xff] }
 0x215   :  { %318 = vadd.xlane.f32.xlu2 %v316_v22  ;;  %v518_v22 = vld [vmem:[#allocation7 + $0x258] sm:$0xff]  ;;  %673 = vmatpush.msrb.mxu3 %v536_v17 }
 0x216   :  { %599 = vmatpush.msrb.mxu1 %v466_v42  ;;  %582 = vmatpush.msrb.mxu0 %v447_v45  ;;  %v514_v45 = vld [vmem:[#allocation7 + $0x238] sm:$0xff] }
 0x217   :  { %655 = vmatpush.msrb.mxu2 %v518_v22  ;;  %674 = vmatpush.msrb.mxu3 %v535_v23  ;;  %v491_v22 = vld [vmem:[#allocation7 + $0x180] sm:$0xff] }
 0x218   :  { %600 = vmatpush.msrb.mxu1 %v465_v44  ;;  %583 = vmatpush.msrb.mxu0 %v446_v47  ;;  %v498_v44 = vld [vmem:[#allocation7 + $0x1b8] sm:$0xff] }
 0x219   :  { %656 = vmatpush.msrb.mxu2 %v517_v27  ;;  %675 = vmatpush.msrb.mxu3 %v534_v28  ;;  %v523_v28 = vld [vmem:[#allocation7 + $0x280] sm:$0xff] }
 0x21a   :  { %601 = vmatpush.msrb.mxu1 %v464_v46  ;;  %584 = vmatpush.msrb.mxu0 %v445_v50  ;;  %v531_v46 = vld [vmem:[#allocation7 + $0x2c0] sm:$0xff]  ;;  %v530_v50 = vld [vmem:[#allocation7 + $0x2b8] sm:$0xff] }
 0x21b   :  { %657 = vmatpush.msrb.mxu2 %v516_v34  ;;  %676 = vmatpush.msrb.mxu3 %v533_v35 }
 0x21c   :  { %602 = vmatpush.msrb.mxu1 %v463_v48  ;;  %585 = vmatpush.msrb.mxu0 %v444_v53  ;;  %v480_v48 = vld [vmem:[#allocation7 + $0x128] sm:$0xff] }
 0x21d   :  { %658 = vmatpush.msrb.mxu2 %v515_v40  ;;  %677 = vmatpush.msrb.mxu3 %v532_v41  ;;  %v496_v53 = vld [vmem:[#allocation7 + $0x1a8] sm:$0xff] }
 0x21e   :  { %603 = vmatpush.msrb.mxu1 %v462_v51  ;;  %586 = vmatpush.msrb.mxu0 %v443_v56 }
 0x21f   :  { %659 = vmatpush.msrb.mxu2 %v514_v45  ;;  %678 = vmatpush.msrb.mxu3 %v531_v46 }
 0x220   :  { %604 = vmatpush.msrb.mxu1 %v461_v54  ;;  %611 = vmatpush.msra.mxu0 %v490_v58  ;;  %v512_v54 = vld [vmem:[#allocation7 + $0x228] sm:$0xff]  ;;  %v478_v58 = vld [vmem:[#allocation7 + $0x118] sm:$0xff] }
 0x221   :  { %679 = vmatpush.msrb.mxu3 %v530_v50 }
 0x222   :  { %605 = vmatpush.msrb.mxu1 %v460_v57  ;;  %612 = vmatpush.msra.mxu0 %v489_v62  ;;  %v528_v62 = vld [vmem:[#allocation7 + $0x2a8] sm:$0xff] }
 0x224   :  { %606 = vmatpush.msrb.mxu1 %v459_v60  ;;  %613 = vmatpush.msra.mxu0 %v488_v3 }
 0x226   :  { %631 = vmatpush.msra.mxu1 %v506_v63  ;;  %614 = vmatpush.msra.mxu0 %v487_v7  ;;  %v476_v7 = vld [vmem:[#allocation7 + $0x108] sm:$0xff] }
 0x228   :  { %632 = vmatpush.msra.mxu1 %v505_v4  ;;  %615 = vmatpush.msra.mxu0 %v486_v14  ;;  %v510_v4 = vld [vmem:[#allocation7 + $0x218] sm:$0xff] }
 0x22a   :  { %633 = vmatpush.msra.mxu1 %v504_v10  ;;  %616 = vmatpush.msra.mxu0 %v485_v19  ;;  %v508_v19 = vld [vmem:[#allocation7 + $0x208] sm:$0xff] }
 0x22c   :  { %634 = vmatpush.msra.mxu1 %v503_v15  ;;  %617 = vmatpush.msra.mxu0 %v484_v25  ;;  %v475_v15 = vld [vmem:[#allocation7 + $0x100] sm:$0xff]  ;;  %v524_v25 = vld [vmem:[#allocation7 + $0x288] sm:$0xff] }
 0x22e   :  { %635 = vmatpush.msra.mxu1 %v502_v20  ;;  %618 = vmatpush.msra.mxu0 %v483_v30  ;;  %v525_v20 = vld [vmem:[#allocation7 + $0x290] sm:$0xff] }
 0x230   :  { %636 = vmatpush.msra.mxu1 %v501_v26  ;;  %619 = vmatpush.msra.mxu0 %v482_v38 }
 0x232   :  { %637 = vmatpush.msra.mxu1 %v500_v31  ;;  %620 = vmatpush.msra.mxu0 %v481_v43 }
 0x234   :  { %638 = vmatpush.msra.mxu1 %v499_v39  ;;  %621 = vmatpush.msra.mxu0 %v480_v48 }
 0x236   :  { %639 = vmatpush.msra.mxu1 %v498_v44 }
 0x280   :  { %v321_v49 = vpop.xlane.xlu2 %320 }
 0x281   :  { %v328_v32 = vrot.slane %v321_v49, 4 }
 0x283   :  { %v329_v52 = vadd.f32 %v328_v32, %v321_v49  ;;  %v497_v49 = vld [vmem:[#allocation7 + $0x1b0] sm:$0xff] }
 0x284   :  { %v513_v32 = vld [vmem:[#allocation7 + $0x230] sm:$0xff]  ;;  %640 = vmatpush.msra.mxu1 %v497_v49 }
 0x285   :  { %v330_v55 = vrot.slane %v329_v52, 2  ;;  %660 = vmatpush.msrb.mxu2 %v513_v32 }
 0x286   :  { %641 = vmatpush.msra.mxu1 %v496_v53 }
 0x287   :  { %v331_v59 = vadd.f32 %v330_v55, %v329_v52  ;;  %v479_v52 = vld [vmem:[#allocation7 + $0x120] sm:$0xff]  ;;  %v529_v55 = vld [vmem:[#allocation7 + $0x2b0] sm:$0xff]  ;;  %661 = vmatpush.msrb.mxu2 %v512_v54  ;;  %v950_v54 = vmov 1934713408  }
 0x288   :  { %v319_v61 = vpop.xlane.xlu2 %318  ;;  %622 = vmatpush.msra.mxu0 %v479_v52  ;;  %680 = vmatpush.msrb.mxu3 %v529_v55  ;;  %v416_v55 = vunpack.c.l.s4 %v950_v54 }
 0x289   :  { %v332_v0 = vrot.slane %v331_v59, 1  ;;  %v322_v1 = vrot.slane %v319_v61, 4 }
 0x28a   :  { %623 = vmatpush.msra.mxu0 %v478_v58  ;;  %681 = vmatpush.msrb.mxu3 %v528_v62 }
 0x28b   :  { %v1011_v8 = vadd.f32 %v332_v0, %v331_v59  ;;  %v323_v9 = vadd.f32 %v322_v1, %v319_v61  ;;  %v495_v59 = vld [vmem:[#allocation7 + $0x1a0] sm:$0xff]  ;;  %v477_v0 = vld [vmem:[#allocation7 + $0x110] sm:$0xff]  ;;  %v494_v1 = vld [vmem:[#allocation7 + $0x198] sm:$0xff] }
 0x28c   :  { %v511_v61 = vld [vmem:[#allocation7 + $0x220] sm:$0xff]  ;;  %642 = vmatpush.msra.mxu1 %v495_v59  ;;  %624 = vmatpush.msra.mxu0 %v477_v0 }
 0x28d   :  { %829 = vrsqrt.f32 %v1011_v8  ;;  %v324_v18 = vrot.slane %v323_v9, 2  ;;  %vm353_vm5 = vcmp.eq.f32.partialorder %v1011_v8, inf  ;;  %v356_v2 = vand.u32 2147483648, %v1011_v8  ;;  %662 = vmatpush.msrb.mxu2 %v511_v61  ;;  %682 = vmatpush.msrb.mxu3 %v527_v5  ;;  %v554_v5 = vld [vmem:[#allocation7 + $0x378] sm:$0xff] }
 0x28e   :  { %vm355_vm6 = vcmp.eq.f32.partialorder %v1011_v8, 0.0  ;;  %643 = vmatpush.msra.mxu1 %v494_v1  ;;  %625 = vmatpush.msra.mxu0 %v476_v7 }
 0x28f   :  { %v325_v24 = vadd.f32 %v324_v18, %v323_v9  ;;  %v493_v9 = vld [vmem:[#allocation7 + $0x190] sm:$0xff]  ;;  %663 = vmatpush.msrb.mxu2 %v510_v4  ;;  %683 = vmatpush.msrb.mxu3 %v526_v13 }
 0x290   :  { %644 = vmatpush.msra.mxu1 %v493_v9  ;;  %626 = vmatpush.msra.mxu0 %v475_v15 }
 0x291   :  { %v326_v29 = vrot.slane %v325_v24, 1  ;;  %664 = vmatpush.msrb.mxu2 %v509_v12  ;;  %684 = vmatpush.msrb.mxu3 %v525_v20  ;;  %v570_v12 = vld [vmem:[#allocation7 + $0x3f8] sm:$0xff] }
 0x292   :  { %645 = vmatpush.msra.mxu1 %v492_v16  ;;  %v552_v16 = vld [vmem:[#allocation7 + $0x368] sm:$0xff] }
 0x293   :  { %v830_v33 = vpop.eup %829  ;;  %v1015_v37 = vadd.f32 %v326_v29, %v325_v24  ;;  %665 = vmatpush.msrb.mxu2 %v508_v19  ;;  %v507_v24 = vld [vmem:[#allocation7 + $0x200] sm:$0xff]  ;;  %685 = vmatpush.msrb.mxu3 %v524_v25  ;;  %v568_v19 = vld [vmem:[#allocation7 + $0x3e8] sm:$0xff]  ;;  %v549_v25 = vld [vmem:[#allocation7 + $0x350] sm:$0xff] }
 0x294   :  { %v347_v36 = vmul.f32 %v830_v33, %v1011_v8  ;;  %646 = vmatpush.msra.mxu1 %v491_v22  ;;  %v550_v22 = vld [vmem:[#allocation7 + $0x358] sm:$0xff] }
 0x295   :  { %831 = vrsqrt.f32 %v1015_v37  ;;  %vm341_vm7 = vcmp.eq.f32.partialorder %v1015_v37, inf  ;;  %v344_v26 = vand.u32 2147483648, %v1015_v37  ;;  %666 = vmatpush.msrb.mxu2 %v507_v24  ;;  %vm343_vm8 = vcmp.eq.f32.partialorder %v1015_v37, 0.0  ;;  %686 = vmatpush.msrb.mxu3 %v523_v28  ;;  %v565_v28 = vld [vmem:[#allocation7 + $0x3d0] sm:$0xff] }
 0x296   :  { %v348_v42 = vmul.f32 %v830_v33, %v347_v36 }
 0x298   :  { %v349_v47 = vmul.f32 0.5, %v348_v42  ;;  %v949_v42 = vmov 1983009808  }
 0x299   :  { %v394_v43 = vunpack.c.l.s4 %v949_v42  ;;  %v542_v42 = vld [vmem:[#allocation7 + $0x318] sm:$0xff] }
 0x29a   :  { %v350_v51 = vsub.f32 1.5, %v349_v47 }
 0x29b   :  { %v832_v56 = vpop.eup %831  ;;  %v395_v49 = vunpack.c.0.s8 %v394_v43  ;;  %v559_v43 = vld [vmem:[#allocation7 + $0x3a0] sm:$0xff] }
 0x29c   :  { %v351_v57 = vmul.f32 %v830_v33, %v350_v51  ;;  %v335_v60 = vmul.f32 %v832_v56, %v1015_v37 }
 0x29e   :  { %v352_v63 = vmul.f32 %v351_v57, %v1011_v8  ;;  %v336_v3 = vmul.f32 %v832_v56, %v335_v60  ;;  %v1032_v60 = vunpack.c.0.s8 %v416_v55 }
 0x2a0   :  { %v354_v6 = vsel %vm353_vm5, %v1011_v8, %v352_v63  ;;  %v337_v10 = vmul.f32 0.5, %v336_v3 }
 0x2a1   :  { %v357_v14 = vsel %vm355_vm6, %v356_v2, %v354_v6 }
 0x2a2   :  { %v359_v17 = vmax.f32 %v357_v14, 1e-12  ;;  %v338_v18 = vsub.f32 1.5, %v337_v10  ;;  %v553_v10 = vld [vmem:[#allocation7 + $0x370] sm:$0xff] }
 0x2a4   :  { %833 = vrcp.f32 %v359_v17  ;;  %v339_v8 = vmul.f32 %v832_v56, %v338_v18  ;;  %v386_v35 = vand.u32 2147483648, %v359_v17  ;;  %v384_v38 = vand.u32 2147483647, %v359_v17 }
 0x2a5   :  { %vm380_vm10 = vweird.f32 %v359_v17 }
 0x2a6   :  { %v340_v23 = vmul.f32 %v339_v8, %v1015_v37  ;;  %v387_v41 = vor.u32 1.1754944e-38, %v386_v35  ;;  %vm385_vm12 = vcmp.eq.f32.partialorder %v384_v38, 8.507059e+37  ;;  %v551_v8 = vld [vmem:[#allocation7 + $0x360] sm:$0xff]  ;;  %v562_v35 = vld [vmem:[#allocation7 + $0x3b8] sm:$0xff]  ;;  %v561_v38 = vld [vmem:[#allocation7 + $0x3b0] sm:$0xff] }
 0x2a8   :  { %v342_v27 = vsel %vm341_vm7, %v1015_v37, %v340_v23  ;;  %v567_v23 = vld [vmem:[#allocation7 + $0x3e0] sm:$0xff] }
 0x2a9   :  { %v345_v30 = vsel %vm343_vm8, %v344_v26, %v342_v27  ;;  %v566_v26 = vld [vmem:[#allocation7 + $0x3d8] sm:$0xff]  ;;  %v548_v27 = vld [vmem:[#allocation7 + $0x348] sm:$0xff] }
 0x2aa   :  { %v834_v29 = vpop.eup %833  ;;  %v358_v31 = vmax.f32 %v345_v30, 1e-12  ;;  %v564_v30 = vld [vmem:[#allocation7 + $0x3c8] sm:$0xff] }
 0x2ab   :  { %v376_v33 = vmul.f32 %v834_v29, %v359_v17  ;;  %vm381_vm9 = vweird.f32 %v834_v29  ;;  %v569_v17 = vld [vmem:[#allocation7 + $0x3f0] sm:$0xff] }
 0x2ac   :  { %835 = vrcp.f32 %v358_v31  ;;  %vm382_vm11 = vmor %vm380_vm10, %vm381_vm9  ;;  %v371_v48 = vand.u32 2147483648, %v358_v31  ;;  %v369_v50 = vand.u32 2147483647, %v358_v31  ;;  %vm365_vm15 = vweird.f32 %v358_v31 }
 0x2ad   :  { %v377_v34 = vsub.f32 1.0, %v376_v33  ;;  %v563_v33 = vld [vmem:[#allocation7 + $0x3c0] sm:$0xff] }
 0x2ae   :  { %v372_v53 = vor.u32 1.1754944e-38, %v371_v48  ;;  %vm370_vm1 = vcmp.eq.f32.partialorder %v369_v50, 8.507059e+37  ;;  %v539_v48 = vld [vmem:[#allocation7 + $0x300] sm:$0xff] }
 0x2af   :  { %v378_v36 = vmul.f32 %v834_v29, %v377_v34  ;;  %v545_v34 = vld [vmem:[#allocation7 + $0x330] sm:$0xff]  ;;  %v555_v50 = vld [vmem:[#allocation7 + $0x380] sm:$0xff] }
 0x2b1   :  { %v379_v39 = vadd.f32 %v834_v29, %v378_v36  ;;  %v544_v36 = vld [vmem:[#allocation7 + $0x328] sm:$0xff] }
 0x2b2   :  { %v836_v40 = vpop.eup %835 }
 0x2b3   :  { %v361_v37 = vmul.f32 %v836_v40, %v358_v31  ;;  %v383_v44 = vsel %vm382_vm11, %v834_v29, %v379_v39  ;;  %vm366_vm13 = vweird.f32 %v836_v40  ;;  %v547_v29 = vld [vmem:[#allocation7 + $0x340] sm:$0xff]  ;;  %v546_v31 = vld [vmem:[#allocation7 + $0x338] sm:$0xff] }
 0x2b4   :  { %v388_v45 = vsel %vm385_vm12, %v387_v41, %v383_v44  ;;  %vm367_vm0 = vmor %vm365_vm15, %vm366_vm13  ;;  %v543_v39 = vld [vmem:[#allocation7 + $0x320] sm:$0xff]  ;;  %v558_v44 = vld [vmem:[#allocation7 + $0x398] sm:$0xff] }
 0x2b5   :  { %v362_v46 = vsub.f32 1.0, %v361_v37  ;;  %v389_v47 = vmul.f32 %v388_v45, %v1002_v11  ;;  %v541_v37 = vld [vmem:[#allocation7 + $0x310] sm:$0xff] }
 0x2b7   :  { %v363_v32 = vmul.f32 %v836_v40, %v362_v46  ;;  %v401_v51 = vrot.slane %v389_v47, 4  ;;  %v406_v57 = vperm.slane %v389_v47, %v395_v49  ;;  %v540_v46 = vld [vmem:[#allocation7 + $0x308] sm:$0xff]  ;;  %v557_v47 = vld [vmem:[#allocation7 + $0x390] sm:$0xff] }
 0x2b9   :  { %v364_v52 = vadd.f32 %v836_v40, %v363_v32  ;;  %v402_v58 = vsel %vm391_vm14, 0.0, %v401_v51  ;;  %v411_v63 = vrot.slane %v406_v57, 4 }
 0x2ba   :  { %v1034_v61 = vperm.slane %v402_v58, %v395_v49 }
 0x2bb   :  { %v368_v56 = vsel %vm367_vm0, %v836_v40, %v364_v52  ;;  %v560_v40 = vld [vmem:[#allocation7 + $0x3a8] sm:$0xff] }
 0x2bc   :  { %v373_v59 = vsel %vm370_vm1, %v372_v53, %v368_v56  ;;  %v423_v7 = vrot.slane %v1034_v61, 4 }
 0x2bd   :  { %v374_v11 = vmul.f32 %v373_v59, %v1007_v21 }
 0x2bf   :  { %v396_v62 = vperm.slane %v374_v11, %v395_v49  ;;  %v390_v0 = vrot.slane %v374_v11, 4 }
 0x2c1   :  { %v412_v1 = vsel %vm391_vm14, %v411_v63, %v396_v62  ;;  %v413_v2 = vrot.slane %v396_v62, 4  ;;  %v392_v3 = vsel %vm391_vm14, 0.0, %v390_v0 }
 0x2c2   :  { %v418_v4 = vperm.slane %v412_v1, %v1032_v60  ;;  %v1039_v6 = vperm.slane %v392_v3, %v395_v49  ;;  %v556_v49 = vld [vmem:[#allocation7 + $0x388] sm:$0xff] }
 0x2c3   :  { %v414_v15 = vsel %vm391_vm14, %v406_v57, %v413_v2 }
 0x2c4   :  { %v435_v9 = vrot.slane %v418_v4, 4  ;;  %587 = vmatmul.f32.vlgmr.msrb.gmra.mxu0 %v418_v4  ;;  %v424_v13 = vsel %vm391_vm14, %v423_v7, %v1039_v6  ;;  %v422_v20 = vperm.slane %v414_v15, %v1032_v60  ;;  %v425_v41 = vrot.slane %v1039_v6, 4 }
 0x2c5   :  { %691 = vmatpush.msrb.mxu0 %v554_v5  ;;  %v430_v14 = vperm.slane %v424_v13, %v1032_v60  ;;  %v951_v5 = vmov 128.0  }
 0x2c6   :  { %794 = vmatmul.msk.f32.vlgmr.msrb.gmra.mxu1 %vm1043_vm2, %v435_v9  ;;  %v437_v24 = vrot.slane %v422_v20, 4  ;;  %v426_v45 = vsel %vm391_vm14, %v1034_v61, %v425_v41  ;;  %837 = vrcp.f32 %v951_v5 }
 0x2c7   :  { %692 = vmatpush.msrb.mxu0 %v553_v10  ;;  %711 = vmatpush.msrb.mxu1 %v570_v12  ;;  %v439_v18 = vrot.slane %v430_v14, 4  ;;  %v434_v32 = vperm.slane %v426_v45, %v1032_v60 }
 0x2c8   :  { %667 = vmatmul.f32.vlgmr.msrb.gmra.mxu2 %v430_v14 }
 0x2c9   :  { %693 = vmatpush.msrb.mxu0 %v552_v16  ;;  %712 = vmatpush.msrb.mxu1 %v569_v17  ;;  %v441_v51 = vrot.slane %v434_v32, 4 }
 0x2ca   :  { %798 = vmatmul.msk.f32.vlgmr.msrb.gmra.mxu3 %vm1043_vm2, %v439_v18 }
 0x2cb   :  { %694 = vmatpush.msrb.mxu0 %v551_v8  ;;  %713 = vmatpush.msrb.mxu1 %v568_v19 }
 0x2cc   :  { %627 = vmatmul.f32.vlgmr.msra.gmra.mxu0 %v422_v20  ;;  %v838_v6 = vpop.eup %837 }
 0x2cd   :  { %695 = vmatpush.msrb.mxu0 %v550_v22  ;;  %714 = vmatpush.msrb.mxu1 %v567_v23  ;;  %v740_v7 = vmul.f32 128.0, %v838_v6  ;;  %vm744_vm4 = vweird.f32 %v838_v6 }
 0x2ce   :  { %796 = vmatmul.msk.f32.vlgmr.msra.gmra.mxu1 %vm1043_vm2, %v437_v24 }
 0x2cf   :  { %696 = vmatpush.msrb.mxu0 %v549_v25  ;;  %715 = vmatpush.msrb.mxu1 %v566_v26  ;;  %v741_v21 = vsub.f32 1.0, %v740_v7 }
 0x2d1   :  { %697 = vmatpush.msrb.mxu0 %v548_v27  ;;  %716 = vmatpush.msrb.mxu1 %v565_v28  ;;  %v742_v9 = vmul.f32 %v838_v6, %v741_v21  ;;  %v811_v27 = vld [vmem:[%s1076_s3] ss:$0 sm:$0xff] }
 0x2d3   :  { %698 = vmatpush.msrb.mxu0 %v547_v29  ;;  %717 = vmatpush.msrb.mxu1 %v564_v30  ;;  %v743_v10 = vadd.f32 %v838_v6, %v742_v9  ;;  %v812_v30 = vld [vmem:[%s1077_s4] ss:$0 sm:$0xff] }
 0x2d5   :  { %699 = vmatpush.msrb.mxu0 %v546_v31  ;;  %718 = vmatpush.msrb.mxu1 %v563_v33  ;;  %v745_v12 = vsel %vm744_vm4, %v838_v6, %v743_v10 }
 0x2d7   :  { %700 = vmatpush.msrb.mxu0 %v545_v34  ;;  %719 = vmatpush.msrb.mxu1 %v562_v35 }
 0x2d9   :  { %701 = vmatpush.msrb.mxu0 %v544_v36  ;;  %720 = vmatpush.msrb.mxu1 %v561_v38 }
 0x2db   :  { %702 = vmatpush.msrb.mxu0 %v543_v39  ;;  %721 = vmatpush.msrb.mxu1 %v560_v40 }
 0x2dd   :  { %703 = vmatpush.msrb.mxu0 %v542_v42  ;;  %722 = vmatpush.msrb.mxu1 %v559_v43 }
 0x2df   :  { %704 = vmatpush.msrb.mxu0 %v541_v37  ;;  %723 = vmatpush.msrb.mxu1 %v558_v44 }
 0x2e1   :  { %705 = vmatpush.msrb.mxu0 %v540_v46  ;;  %724 = vmatpush.msrb.mxu1 %v557_v47 }
 0x2e3   :  { %706 = vmatpush.msrb.mxu0 %v539_v48  ;;  %725 = vmatpush.msrb.mxu1 %v556_v49 }
 0x2e4   :  { %707 = vmatmul.f32.vlgmr.msrb.gmra.mxu0 %v434_v32 }
 0x2e5   :  { %726 = vmatpush.msrb.mxu1 %v555_v50 }
 0x2e6   :  { %800 = vmatmul.msk.f32.vlgmr.msrb.gmra.mxu1 %vm1043_vm2, %v441_v51 }
 0x341   :  { %v588_v52 = vpop.f32.mrf.mxu0 }
 0x343   :  { %v608_v53 = vpop.f32.mrf.mxu1 }
 0x344   :  { %v609_v55 = vadd.f32 %v608_v53, %v588_v52 }
 0x349   :  { %v628_v54 = vpop.f32.mrf.mxu0 }
 0x34a   :  { %v629_v56 = vadd.f32 %v628_v54, %v609_v55 }
 0x34b   :  { %v648_v57 = vpop.f32.mrf.mxu1  ;;  %v668_v59 = vpop.f32.mrf.mxu2 }
 0x34c   :  { %v649_v58 = vadd.f32 %v648_v57, %v629_v56 }
 0x34d   :  { %v688_v60 = vpop.f32.mrf.mxu3 }
 0x34e   :  { %v669_v11 = vadd.f32 %v668_v59, %v649_v58 }
 0x350   :  { %v689_v61 = vadd.f32 %v688_v60, %v669_v11 }
 0x361   :  { %v708_v62 = vpop.f32.mrf.mxu0 }
 0x362   :  { %v709_v63 = vadd.f32 %v708_v62, %v689_v61 }
 0x363   :  { %v728_v0 = vpop.f32.mrf.mxu1 }
 0x364   :  { %v729_v1 = vadd.f32 %v728_v0, %v709_v63 }
 0x366   :  { %v732_v2 = vsel %vm731_vm3, %v729_v1, 0.0  ;;  %v735_v3 = vmul.f32 %v729_v1, %v729_v1 }
 0x367   :  { %733 = vadd.xlane.f32.xlu0 %v732_v2 }
 0x368   :  { %v736_v4 = vsel %vm731_vm3, %v735_v3, 0.0 }
 0x369   :  { %737 = vadd.xlane.f32.xlu1 %v736_v4 }
 0x3da   :  { %v734_v13 = vpop.xlane.xlu0 %733 }
 0x3db   :  { %v746_v14 = vmul.f32 %v745_v12, %v734_v13 }
 0x3dc   :  { %v738_v15 = vpop.xlane.xlu1 %737 }
 0x3dd   :  { %v748_v16 = vmul.f32 %v746_v14, %v746_v14  ;;  %v747_v17 = vmul.f32 %v745_v12, %v738_v15  ;;  %v750_v26 = vsub.f32 %v729_v1, %v746_v14 }
 0x3df   :  { %v749_v18 = vsub.f32 %v747_v17, %v748_v16 }
 0x3e1   :  { %v751_v8 = vadd.f32 1e-05, %v749_v18 }
 0x3e3   :  { %839 = vrsqrt.f32 %v751_v8  ;;  %vm758_vm6 = vweird.f32 %v751_v8 }
 0x3e9   :  { %v840_v19 = vpop.eup %839 }
 0x3ea   :  { %v753_v20 = vmul.f32 %v840_v19, %v751_v8  ;;  %vm759_vm5 = vweird.f32 %v840_v19 }
 0x3eb   :  { %vm760_vm7 = vmor %vm758_vm6, %vm759_vm5 }
 0x3ec   :  { %v754_v22 = vmul.f32 %v840_v19, %v753_v20 }
 0x3ee   :  { %v755_v23 = vmul.f32 0.5, %v754_v22 }
 0x3f0   :  { %v756_v24 = vsub.f32 1.5, %v755_v23 }
 0x3f2   :  { %v757_v25 = vmul.f32 %v840_v19, %v756_v24 }
 0x3f4   :  { %v761_v28 = vsel %vm760_vm7, %v840_v19, %v757_v25 }
 0x3f5   :  { %v762_v29 = vmul.f32 %v761_v28, %v750_v26 }
 0x3f7   :  { %v767_v31 = vmul.f32 %v811_v27, %v762_v29 }
 0x3f9   :  { %v772_v33 = vadd.f32 %v812_v30, %v767_v31 }
 0x3fb   :  { %773 = vst [vmem:[#allocation8] sm:$0x3] %v772_v33 }
 0x3fc   :  { %784 = dma.vmem_to_hbm [thread:$0]  %s780_s12, 32, %s782_s15, [#allocation4]  }
 0x3fd   :  { %941 = dma.done.wait [#allocation4], 32  }
 0x3fe   :  { %942 = vsyncadd [#allocation4], 4294967264 }
 0x3ff   :  { %789 = vsyncpa [#allocation3], 1 }
 0x400   :  { %790 = vsyncpa [#allocation6], 1 }
 0x401   :  { %791 = vsyncpa [#allocation4], 1 }

</bundles_post_ra>
